<compile_context>
chip_gen: v6e
topology: v6e:2x2x1
jax: 0.10.0
libtpu: 0.0.40
codegen_flags: <defaults>
</compile_context>

<pallas_src>
import math
from functools import partial

import jax
import jax.numpy as jnp
from jax.experimental import pallas as pl
from jax.experimental.pallas import tpu as pltpu

_LN_EPS = 1e-5                       # torch.nn.LayerNorm default
_INV_SQRT2 = 0.7071067811865476      # exact (erf) GELU


# ----------------------------- in-kernel helpers -----------------------------

def _layernorm(x, gamma, beta):
    mu = jnp.mean(x, axis=-1, keepdims=True)
    var = jnp.mean((x - mu) ** 2, axis=-1, keepdims=True)
    return (x - mu) * jax.lax.rsqrt(var + _LN_EPS) * gamma + beta


def _mha(q, k, v, heads, dh, scale, want_sim_sum=False):
    """Multi-head attention on lane-concatenated heads.

    q: (N, inner) f32, k/v: (Nc, inner) f32.
    Returns (out (N, inner) f32 lane-dense,
             sim_sum (N, Nc) f32 = sum over heads of pre-softmax logits, or None).
    """
    outs = []
    sim_sum = None
    for h in range(heads):                       # static unroll, tiny head dims
        lo, hi = h * dh, (h + 1) * dh
        qh = q[:, lo:hi].astype(jnp.bfloat16)
        kh = k[:, lo:hi].astype(jnp.bfloat16)
        vh = v[:, lo:hi].astype(jnp.bfloat16)
        # contract last dims directly (no explicit k.T / XLU transpose)
        sim = jax.lax.dot_general(
            qh, kh, (((1,), (1,)), ((), ())),
            preferred_element_type=jnp.float32) * scale          # (N, Nc) f32
        if want_sim_sum:
            sim_sum = sim if sim_sum is None else sim_sum + sim
        m = jnp.max(sim, axis=-1, keepdims=True)
        p = jnp.exp(sim - m)
        denom = jnp.sum(p, axis=-1, keepdims=True)
        attn = p * pl.reciprocal(denom, approx=True)             # EUP vrcp slot
        outs.append(jnp.dot(attn.astype(jnp.bfloat16), vh,
                            preferred_element_type=jnp.float32))  # (N, dh)
    return jnp.concatenate(outs, axis=-1), sim_sum


# ----------------------------- fused Pallas kernel -----------------------------

def _block_kernel(x_ref, ctx_ref, mask_ref,
                  g1_ref, b1_ref, wqkv_ref, wo1_ref, bo1_ref,
                  g2_ref, b2_ref, wq_ref, wkv_ref, wo2_ref, bo2_ref,
                  g3_ref, b3_ref, w1x_ref, b1x_ref, w1g_ref, b1g_ref,
                  w2_ref, b2f_ref,
                  o_ref, loss_ref, *, heads, scale1, scale2):
    x = x_ref[0]                                                  # (N, D) f32

    # ---------- sub-block 1: self-attention ----------
    xn = _layernorm(x, g1_ref[...], b1_ref[...])
    qkv = jnp.dot(xn.astype(jnp.bfloat16), wqkv_ref[...],
                  preferred_element_type=jnp.float32)             # (N, 3*inner)
    inner = wqkv_ref.shape[1] // 3
    dh = inner // heads
    q = qkv[:, :inner]
    k = qkv[:, inner:2 * inner]
    v = qkv[:, 2 * inner:]
    att, _ = _mha(q, k, v, heads, dh, scale1)                     # sim not needed
    x = x + (jnp.dot(att.astype(jnp.bfloat16), wo1_ref[...],
                     preferred_element_type=jnp.float32) + bo1_ref[...])

    # ---------- sub-block 2: cross-attention + BCE mask loss ----------
    ctx = ctx_ref[0]                                              # (Nc, Dc) f32
    xn = _layernorm(x, g2_ref[...], b2_ref[...])
    q = jnp.dot(xn.astype(jnp.bfloat16), wq_ref[...],
                preferred_element_type=jnp.float32)               # (N, inner2)
    kv = jnp.dot(ctx.astype(jnp.bfloat16), wkv_ref[...],
                 preferred_element_type=jnp.float32)              # (Nc, 2*inner2)
    inner2 = wq_ref.shape[1]
    dh2 = inner2 // heads
    k = kv[:, :inner2]
    v = kv[:, inner2:]
    att, sim_sum = _mha(q, k, v, heads, dh2, scale2, want_sim_sum=True)
    x = x + (jnp.dot(att.astype(jnp.bfloat16), wo2_ref[...],
                     preferred_element_type=jnp.float32) + bo2_ref[...])

    # BCEWithLogits (PyTorch stable form): max(z,0) - z*m + log(1 + exp(-|z|))
    # z = head-MEAN pre-softmax logits; m = nearest-resized mask rearranged to
    # (N, Nc) token-major in the wrapper.  Reduced to a per-batch scalar here.
    z = sim_sum * (1.0 / heads)                                   # (N, Nc) f32
    m = mask_ref[0]                                               # (N, Nc) f32
    bce = jnp.maximum(z, 0.0) - z * m + jnp.log(1.0 + jnp.exp(-jnp.abs(z)))
    loss_ref[0] = jnp.sum(bce, keepdims=True)                     # (1, 1)

    # ---------- sub-block 3: gated feed-forward (GEGLU) ----------
    xn = _layernorm(x, g3_ref[...], b3_ref[...]).astype(jnp.bfloat16)
    hx = jnp.dot(xn, w1x_ref[...], preferred_element_type=jnp.float32) + b1x_ref[...]
    hg = jnp.dot(xn, w1g_ref[...], preferred_element_type=jnp.float32) + b1g_ref[...]
    gelu = 0.5 * hg * (1.0 + jax.lax.erf(hg * _INV_SQRT2))        # exact GELU
    hidden = (hx * gelu).astype(jnp.bfloat16)                     # GEGLU
    x = x + (jnp.dot(hidden, w2_ref[...], preferred_element_type=jnp.float32)
             + b2f_ref[...])

    o_ref[0] = x                                                  # final residual sum


# ----------------------------- wrapper -----------------------------

def _vec2(v):
    return v.reshape(1, -1)


def basic_transformer_block(params, x, context, mask, n_heads):
    """BasicTransformerBlock._forward.  Dropout p=0 -> identity; gradient
    checkpointing only affects the backward pass, forward semantics identical."""
    B, N, D = x.shape
    Nc, Dc = context.shape[1], context.shape[2]
    p1, p2, pf = params["attn1"], params["attn2"], params["ff"]

    inner1 = p1["wqkv"].shape[1] // 3
    inner2 = p2["wq"].shape[1]
    ff_inner = pf["w1x"].shape[1]
    scale1 = (inner1 // n_heads) ** (-0.5)
    scale2 = (inner2 // n_heads) ** (-0.5)

    # Nearest-neighbour mask resize (F.interpolate mode='nearest':
    # src = floor(dst * src_size / dst_size)) + rearrange to token-major (B,N,Nc).
    s = int(round(math.sqrt(N)))
    mh, mw = mask.shape[2], mask.shape[3]
    ih = (jnp.arange(s) * mh) // s
    iw = (jnp.arange(s) * mw) // s
    m_near = mask[:, :Nc][:, :, ih, :][:, :, :, iw]               # (B, Nc, s, s)
    mask_n = jnp.transpose(m_near, (0, 2, 3, 1)).reshape(B, N, Nc)

    const2 = lambda b: (0, 0)
    out, loss_sums = pl.pallas_call(
        partial(_block_kernel, heads=n_heads, scale1=scale1, scale2=scale2),
        out_shape=(jax.ShapeDtypeStruct((B, N, D), jnp.float32),
                   jax.ShapeDtypeStruct((B, 1, 1), jnp.float32)),
        grid=(B,),
        in_specs=[
            pl.BlockSpec((1, N, D), lambda b: (b, 0, 0)),          # x
            pl.BlockSpec((1, Nc, Dc), lambda b: (b, 0, 0)),        # context
            pl.BlockSpec((1, N, Nc), lambda b: (b, 0, 0)),         # resized mask
            pl.BlockSpec((1, D), const2),                          # norm1 gamma
            pl.BlockSpec((1, D), const2),                          # norm1 beta
            pl.BlockSpec((D, 3 * inner1), const2),                 # wqkv
            pl.BlockSpec((inner1, D), const2),                     # wo1
            pl.BlockSpec((1, D), const2),                          # bo1
            pl.BlockSpec((1, D), const2),                          # norm2 gamma
            pl.BlockSpec((1, D), const2),                          # norm2 beta
            pl.BlockSpec((D, inner2), const2),                     # wq
            pl.BlockSpec((Dc, 2 * inner2), const2),                # wkv
            pl.BlockSpec((inner2, D), const2),                     # wo2
            pl.BlockSpec((1, D), const2),                          # bo2
            pl.BlockSpec((1, D), const2),                          # norm3 gamma
            pl.BlockSpec((1, D), const2),                          # norm3 beta
            pl.BlockSpec((D, ff_inner), const2),                   # w1 (x half)
            pl.BlockSpec((1, ff_inner), const2),                   # b1 (x half)
            pl.BlockSpec((D, ff_inner), const2),                   # w1 (gate half)
            pl.BlockSpec((1, ff_inner), const2),                   # b1 (gate half)
            pl.BlockSpec((ff_inner, D), const2),                   # w2
            pl.BlockSpec((1, D), const2),                          # b2
        ],
        out_specs=(pl.BlockSpec((1, N, D), lambda b: (b, 0, 0)),
                   pl.BlockSpec((1, 1, 1), lambda b: (b, 0, 0))),
        compiler_params=pltpu.CompilerParams(
            dimension_semantics=("parallel",)),
    )(x, context, mask_n,
      _vec2(params["norm1_g"]), _vec2(params["norm1_b"]),
      p1["wqkv"], p1["wo"], _vec2(p1["bo"]),
      _vec2(params["norm2_g"]), _vec2(params["norm2_b"]),
      p2["wq"], p2["wkv"], p2["wo"], _vec2(p2["bo"]),
      _vec2(params["norm3_g"]), _vec2(params["norm3_b"]),
      pf["w1x"], _vec2(pf["b1x"]), pf["w1g"], _vec2(pf["b1g"]),
      pf["w2"], _vec2(pf["b2"]))

    # PyTorch: per-channel mean BCE averaged over channels == global mean.
    loss = jnp.sum(loss_sums) / (B * N * Nc)
    return out, loss


# ----------------------------- params -----------------------------

def init_params(key, dim, n_heads, d_head, context_dim):
    inner = n_heads * d_head
    ff_inner = int(dim * 4)
    ks = jax.random.split(key, 10)
    bf = jnp.bfloat16

    def w(k, shape, scale=0.02):
        return jax.random.normal(k, shape, jnp.float32) * scale

    wq1, wk1, wv1 = w(ks[0], (dim, inner)), w(ks[1], (dim, inner)), w(ks[2], (dim, inner))
    wo1 = w(ks[3], (inner, dim))
    wq2 = w(ks[4], (dim, inner))
    wk2, wv2 = w(ks[5], (context_dim, inner)), w(ks[6], (context_dim, inner))
    wo2 = w(ks[7], (inner, dim))
    w1 = w(ks[8], (dim, ff_inner * 2))
    w2 = w(ks[9], (ff_inner, dim))

    return {
        "norm1_g": jnp.ones((dim,), jnp.float32), "norm1_b": jnp.zeros((dim,), jnp.float32),
        "norm2_g": jnp.ones((dim,), jnp.float32), "norm2_b": jnp.zeros((dim,), jnp.float32),
        "norm3_g": jnp.ones((dim,), jnp.float32), "norm3_b": jnp.zeros((dim,), jnp.float32),
        "attn1": {  # self-attention: fused QKV weight
            "wqkv": jnp.concatenate([wq1, wk1, wv1], axis=1).astype(bf),
            "wo": wo1.astype(bf),
            "bo": jnp.zeros((dim,), jnp.float32),
        },
        "attn2": {  # cross-attention: Q separate (query dim), KV fused (context dim)
            "wq": wq2.astype(bf),
            "wkv": jnp.concatenate([wk2, wv2], axis=1).astype(bf),
            "wo": wo2.astype(bf),
            "bo": jnp.zeros((dim,), jnp.float32),
        },
        "ff": {     # GEGLU proj split into x-half / gate-half -> no lane-slice in kernel
            "w1x": w1[:, :ff_inner].astype(bf),
            "w1g": w1[:, ff_inner:].astype(bf),
            "b1x": jnp.zeros((ff_inner,), jnp.float32),
            "b1g": jnp.zeros((ff_inner,), jnp.float32),
            "w2": w2.astype(bf),
            "b2": jnp.zeros((dim,), jnp.float32),
        },
    }


# ----------------------------- main -----------------------------

if __name__ == "__main__":
    B = 2
    DIM = 32            # query_dim
    N_HEADS = 4
    D_HEAD = 8          # inner_dim = 32
    S = 4
    N = S * S           # 16 query tokens laid out as a 4x4 spatial grid
    N_CTX = 8           # context tokens (mask needs >= N_CTX channels)
    CTX_DIM = DIM       # context_dim defaults to query_dim
    MH = MW = 8         # mask spatial size, nearest-interpolated to (S, S)

    key = jax.random.PRNGKey(0)
    kp, kx, kc, km = jax.random.split(key, 4)
    params = init_params(kp, DIM, N_HEADS, D_HEAD, CTX_DIM)
    x = jax.random.normal(kx, (B, N, DIM), jnp.float32)
    context = jax.random.normal(kc, (B, N_CTX, CTX_DIM), jnp.float32)
    mask = jax.random.uniform(km, (B, N_CTX, MH, MW), jnp.float32)

    block_fn = jax.jit(partial(basic_transformer_block, n_heads=N_HEADS))
    out, loss = block_fn(params, x, context, mask)
    jax.block_until_ready(out)
    jax.block_until_ready(loss)
    assert out.shape == (B, N, DIM) and loss.shape == ()
    assert jnp.isfinite(out).all() and jnp.isfinite(loss)
    print("KERNEL_OK")
</pallas_src>

<mosaic_0001>
module attributes {stable_mosaic.version = 11 : i64} {
  func.func @_block_kernel(%arg0: i32, %arg1: memref<1x16x32xf32, #tpu.memory_space<vmem>>, %arg2: memref<1x8x32xf32, #tpu.memory_space<vmem>>, %arg3: memref<1x16x8xf32, #tpu.memory_space<vmem>>, %arg4: memref<1x32xf32, #tpu.memory_space<vmem>>, %arg5: memref<1x32xf32, #tpu.memory_space<vmem>>, %arg6: memref<32x96xbf16, #tpu.memory_space<vmem>>, %arg7: memref<32x32xbf16, #tpu.memory_space<vmem>>, %arg8: memref<1x32xf32, #tpu.memory_space<vmem>>, %arg9: memref<1x32xf32, #tpu.memory_space<vmem>>, %arg10: memref<1x32xf32, #tpu.memory_space<vmem>>, %arg11: memref<32x32xbf16, #tpu.memory_space<vmem>>, %arg12: memref<32x64xbf16, #tpu.memory_space<vmem>>, %arg13: memref<32x32xbf16, #tpu.memory_space<vmem>>, %arg14: memref<1x32xf32, #tpu.memory_space<vmem>>, %arg15: memref<1x32xf32, #tpu.memory_space<vmem>>, %arg16: memref<1x32xf32, #tpu.memory_space<vmem>>, %arg17: memref<32x128xbf16, #tpu.memory_space<vmem>>, %arg18: memref<1x128xf32, #tpu.memory_space<vmem>>, %arg19: memref<32x128xbf16, #tpu.memory_space<vmem>>, %arg20: memref<1x128xf32, #tpu.memory_space<vmem>>, %arg21: memref<128x32xbf16, #tpu.memory_space<vmem>>, %arg22: memref<1x32xf32, #tpu.memory_space<vmem>>, %arg23: memref<1x16x32xf32, #tpu.memory_space<vmem>>, %arg24: memref<1x1x1xf32, #tpu.memory_space<vmem>>) attributes {dimension_semantics = [#tpu.dimension_semantics<parallel>], iteration_bounds = array<i64: 2>, scalar_prefetch = 0 : i64, scratch_operands = 0 : i64, tpu.core_type = #tpu.core_type<tc>, window_params = [{transform_indices = @transform_0, window_bounds = array<i64: 1, 16, 32>}, {transform_indices = @transform_1, window_bounds = array<i64: 1, 8, 32>}, {transform_indices = @transform_2, window_bounds = array<i64: 1, 16, 8>}, {pipeline_mode = #tpu.pipeline_mode<synchronous>, transform_indices = @transform_3, window_bounds = array<i64: 1, 32>}, {pipeline_mode = #tpu.pipeline_mode<synchronous>, transform_indices = @transform_4, window_bounds = array<i64: 1, 32>}, {pipeline_mode = #tpu.pipeline_mode<synchronous>, transform_indices = @transform_5, window_bounds = array<i64: 32, 96>}, {pipeline_mode = #tpu.pipeline_mode<synchronous>, transform_indices = @transform_6, window_bounds = array<i64: 32, 32>}, {pipeline_mode = #tpu.pipeline_mode<synchronous>, transform_indices = @transform_7, window_bounds = array<i64: 1, 32>}, {pipeline_mode = #tpu.pipeline_mode<synchronous>, transform_indices = @transform_8, window_bounds = array<i64: 1, 32>}, {pipeline_mode = #tpu.pipeline_mode<synchronous>, transform_indices = @transform_9, window_bounds = array<i64: 1, 32>}, {pipeline_mode = #tpu.pipeline_mode<synchronous>, transform_indices = @transform_10, window_bounds = array<i64: 32, 32>}, {pipeline_mode = #tpu.pipeline_mode<synchronous>, transform_indices = @transform_11, window_bounds = array<i64: 32, 64>}, {pipeline_mode = #tpu.pipeline_mode<synchronous>, transform_indices = @transform_12, window_bounds = array<i64: 32, 32>}, {pipeline_mode = #tpu.pipeline_mode<synchronous>, transform_indices = @transform_13, window_bounds = array<i64: 1, 32>}, {pipeline_mode = #tpu.pipeline_mode<synchronous>, transform_indices = @transform_14, window_bounds = array<i64: 1, 32>}, {pipeline_mode = #tpu.pipeline_mode<synchronous>, transform_indices = @transform_15, window_bounds = array<i64: 1, 32>}, {pipeline_mode = #tpu.pipeline_mode<synchronous>, transform_indices = @transform_16, window_bounds = array<i64: 32, 128>}, {pipeline_mode = #tpu.pipeline_mode<synchronous>, transform_indices = @transform_17, window_bounds = array<i64: 1, 128>}, {pipeline_mode = #tpu.pipeline_mode<synchronous>, transform_indices = @transform_18, window_bounds = array<i64: 32, 128>}, {pipeline_mode = #tpu.pipeline_mode<synchronous>, transform_indices = @transform_19, window_bounds = array<i64: 1, 128>}, {pipeline_mode = #tpu.pipeline_mode<synchronous>, transform_indices = @transform_20, window_bounds = array<i64: 128, 32>}, {pipeline_mode = #tpu.pipeline_mode<synchronous>, transform_indices = @transform_21, window_bounds = array<i64: 1, 32>}, {transform_indices = @transform_22, window_bounds = array<i64: 1, 16, 32>}, {transform_indices = @transform_23, window_bounds = array<i64: 1, 1, 1>}]} {
    %c0 = arith.constant 0 : index
    %c0_0 = arith.constant 0 : index
    %c0_1 = arith.constant 0 : index
    %0 = vector.load %arg1[%c0, %c0_0, %c0_1] : memref<1x16x32xf32, #tpu.memory_space<vmem>>, vector<1x16x32xf32>
    %1 = vector.shape_cast %0 : vector<1x16x32xf32> to vector<16x32xf32>
    %c0_2 = arith.constant 0 : index
    %c0_3 = arith.constant 0 : index
    %2 = vector.load %arg4[%c0_2, %c0_3] : memref<1x32xf32, #tpu.memory_space<vmem>>, vector<1x32xf32>
    %c0_4 = arith.constant 0 : index
    %c0_5 = arith.constant 0 : index
    %3 = vector.load %arg5[%c0_4, %c0_5] : memref<1x32xf32, #tpu.memory_space<vmem>>, vector<1x32xf32>
    %cst = arith.constant dense<0.000000e+00> : vector<16xf32>
    %4 = vector.multi_reduction <add>, %1, %cst [1] : vector<16x32xf32> to vector<16xf32>
    %5 = vector.shape_cast %4 : vector<16xf32> to vector<16x1xf32>
    %cst_6 = arith.constant 3.200000e+01 : f32
    %6 = vector.broadcast %cst_6 : f32 to vector<16x1xf32>
    %7 = arith.divf %5, %6 : vector<16x1xf32>
    %8 = vector.broadcast %7 : vector<16x1xf32> to vector<16x32xf32>
    %9 = arith.subf %1, %8 : vector<16x32xf32>
    %10 = arith.mulf %9, %9 : vector<16x32xf32>
    %cst_7 = arith.constant dense<0.000000e+00> : vector<16xf32>
    %11 = vector.multi_reduction <add>, %10, %cst_7 [1] : vector<16x32xf32> to vector<16xf32>
    %12 = vector.shape_cast %11 : vector<16xf32> to vector<16x1xf32>
    %cst_8 = arith.constant 3.200000e+01 : f32
    %13 = vector.broadcast %cst_8 : f32 to vector<16x1xf32>
    %14 = arith.divf %12, %13 : vector<16x1xf32>
    %15 = vector.broadcast %7 : vector<16x1xf32> to vector<16x32xf32>
    %16 = arith.subf %1, %15 : vector<16x32xf32>
    %cst_9 = arith.constant 9.99999974E-6 : f32
    %17 = vector.broadcast %cst_9 : f32 to vector<16x1xf32>
    %18 = arith.addf %14, %17 : vector<16x1xf32>
    %19 = math.rsqrt %18 : vector<16x1xf32>
    %20 = vector.broadcast %19 : vector<16x1xf32> to vector<16x32xf32>
    %21 = arith.mulf %16, %20 : vector<16x32xf32>
    %22 = vector.broadcast %2 : vector<1x32xf32> to vector<16x32xf32>
    %23 = arith.mulf %21, %22 : vector<16x32xf32>
    %24 = vector.broadcast %3 : vector<1x32xf32> to vector<16x32xf32>
    %25 = arith.addf %23, %24 : vector<16x32xf32>
    %26 = arith.truncf %25 : vector<16x32xf32> to vector<16x32xbf16>
    %c0_10 = arith.constant 0 : index
    %c0_11 = arith.constant 0 : index
    %27 = vector.load %arg6[%c0_10, %c0_11] : memref<32x96xbf16, #tpu.memory_space<vmem>>, vector<32x96xbf16>
    %cst_12 = arith.constant dense<0.000000e+00> : vector<16x96xf32>
    %28 = tpu.matmul %26, %27, %cst_12 {dimension_numbers = #tpu.dot_dimension_numbers<[1], [0], [0], [1], [0, 0, 1, 1], [], []>} : vector<16x32xbf16>, vector<32x96xbf16>, vector<16x96xf32> -> vector<16x96xf32>
    %29 = vector.extract_strided_slice %28 {offsets = [0, 0], sizes = [16, 32], strides = [1, 1]} : vector<16x96xf32> to vector<16x32xf32>
    %30 = vector.extract_strided_slice %28 {offsets = [0, 32], sizes = [16, 32], strides = [1, 1]} : vector<16x96xf32> to vector<16x32xf32>
    %31 = vector.extract_strided_slice %28 {offsets = [0, 64], sizes = [16, 32], strides = [1, 1]} : vector<16x96xf32> to vector<16x32xf32>
    %32 = vector.extract_strided_slice %29 {offsets = [0, 0], sizes = [16, 8], strides = [1, 1]} : vector<16x32xf32> to vector<16x8xf32>
    %33 = arith.truncf %32 : vector<16x8xf32> to vector<16x8xbf16>
    %34 = vector.extract_strided_slice %30 {offsets = [0, 0], sizes = [16, 8], strides = [1, 1]} : vector<16x32xf32> to vector<16x8xf32>
    %35 = arith.truncf %34 : vector<16x8xf32> to vector<16x8xbf16>
    %36 = vector.extract_strided_slice %31 {offsets = [0, 0], sizes = [16, 8], strides = [1, 1]} : vector<16x32xf32> to vector<16x8xf32>
    %37 = arith.truncf %36 : vector<16x8xf32> to vector<16x8xbf16>
    %cst_13 = arith.constant dense<0.000000e+00> : vector<16x16xf32>
    %38 = tpu.matmul %33, %35, %cst_13 {dimension_numbers = #tpu.dot_dimension_numbers<[1], [1], [0], [0], [0, 0, 1, 0], [], []>} : vector<16x8xbf16>, vector<16x8xbf16>, vector<16x16xf32> -> vector<16x16xf32>
    %cst_14 = arith.constant 0.353553385 : f32
    %39 = vector.broadcast %cst_14 : f32 to vector<16x16xf32>
    %40 = arith.mulf %38, %39 : vector<16x16xf32>
    %cst_15 = arith.constant dense<0xFF800000> : vector<16xf32>
    %41 = vector.multi_reduction <maximumf>, %40, %cst_15 [1] : vector<16x16xf32> to vector<16xf32>
    %42 = vector.shape_cast %41 : vector<16xf32> to vector<16x1xf32>
    %43 = vector.broadcast %42 : vector<16x1xf32> to vector<16x16xf32>
    %44 = arith.subf %40, %43 : vector<16x16xf32>
    %45 = math.exp %44 : vector<16x16xf32>
    %cst_16 = arith.constant dense<0.000000e+00> : vector<16xf32>
    %46 = vector.multi_reduction <add>, %45, %cst_16 [1] : vector<16x16xf32> to vector<16xf32>
    %47 = vector.shape_cast %46 : vector<16xf32> to vector<16x1xf32>
    %48 = tpu.reciprocal %47 {approx = true} : vector<16x1xf32> -> vector<16x1xf32>
    %49 = vector.broadcast %48 : vector<16x1xf32> to vector<16x16xf32>
    %50 = arith.mulf %45, %49 : vector<16x16xf32>
    %51 = arith.truncf %50 : vector<16x16xf32> to vector<16x16xbf16>
    %cst_17 = arith.constant dense<0.000000e+00> : vector<16x8xf32>
    %52 = tpu.matmul %51, %37, %cst_17 {dimension_numbers = #tpu.dot_dimension_numbers<[1], [0], [0], [1], [0, 0, 1, 1], [], []>} : vector<16x16xbf16>, vector<16x8xbf16>, vector<16x8xf32> -> vector<16x8xf32>
    %53 = vector.extract_strided_slice %29 {offsets = [0, 8], sizes = [16, 8], strides = [1, 1]} : vector<16x32xf32> to vector<16x8xf32>
    %54 = arith.truncf %53 : vector<16x8xf32> to vector<16x8xbf16>
    %55 = vector.extract_strided_slice %30 {offsets = [0, 8], sizes = [16, 8], strides = [1, 1]} : vector<16x32xf32> to vector<16x8xf32>
    %56 = arith.truncf %55 : vector<16x8xf32> to vector<16x8xbf16>
    %57 = vector.extract_strided_slice %31 {offsets = [0, 8], sizes = [16, 8], strides = [1, 1]} : vector<16x32xf32> to vector<16x8xf32>
    %58 = arith.truncf %57 : vector<16x8xf32> to vector<16x8xbf16>
    %cst_18 = arith.constant dense<0.000000e+00> : vector<16x16xf32>
    %59 = tpu.matmul %54, %56, %cst_18 {dimension_numbers = #tpu.dot_dimension_numbers<[1], [1], [0], [0], [0, 0, 1, 0], [], []>} : vector<16x8xbf16>, vector<16x8xbf16>, vector<16x16xf32> -> vector<16x16xf32>
    %cst_19 = arith.constant 0.353553385 : f32
    %60 = vector.broadcast %cst_19 : f32 to vector<16x16xf32>
    %61 = arith.mulf %59, %60 : vector<16x16xf32>
    %cst_20 = arith.constant dense<0xFF800000> : vector<16xf32>
    %62 = vector.multi_reduction <maximumf>, %61, %cst_20 [1] : vector<16x16xf32> to vector<16xf32>
    %63 = vector.shape_cast %62 : vector<16xf32> to vector<16x1xf32>
    %64 = vector.broadcast %63 : vector<16x1xf32> to vector<16x16xf32>
    %65 = arith.subf %61, %64 : vector<16x16xf32>
    %66 = math.exp %65 : vector<16x16xf32>
    %cst_21 = arith.constant dense<0.000000e+00> : vector<16xf32>
    %67 = vector.multi_reduction <add>, %66, %cst_21 [1] : vector<16x16xf32> to vector<16xf32>
    %68 = vector.shape_cast %67 : vector<16xf32> to vector<16x1xf32>
    %69 = tpu.reciprocal %68 {approx = true} : vector<16x1xf32> -> vector<16x1xf32>
    %70 = vector.broadcast %69 : vector<16x1xf32> to vector<16x16xf32>
    %71 = arith.mulf %66, %70 : vector<16x16xf32>
    %72 = arith.truncf %71 : vector<16x16xf32> to vector<16x16xbf16>
    %cst_22 = arith.constant dense<0.000000e+00> : vector<16x8xf32>
    %73 = tpu.matmul %72, %58, %cst_22 {dimension_numbers = #tpu.dot_dimension_numbers<[1], [0], [0], [1], [0, 0, 1, 1], [], []>} : vector<16x16xbf16>, vector<16x8xbf16>, vector<16x8xf32> -> vector<16x8xf32>
    %74 = vector.extract_strided_slice %29 {offsets = [0, 16], sizes = [16, 8], strides = [1, 1]} : vector<16x32xf32> to vector<16x8xf32>
    %75 = arith.truncf %74 : vector<16x8xf32> to vector<16x8xbf16>
    %76 = vector.extract_strided_slice %30 {offsets = [0, 16], sizes = [16, 8], strides = [1, 1]} : vector<16x32xf32> to vector<16x8xf32>
    %77 = arith.truncf %76 : vector<16x8xf32> to vector<16x8xbf16>
    %78 = vector.extract_strided_slice %31 {offsets = [0, 16], sizes = [16, 8], strides = [1, 1]} : vector<16x32xf32> to vector<16x8xf32>
    %79 = arith.truncf %78 : vector<16x8xf32> to vector<16x8xbf16>
    %cst_23 = arith.constant dense<0.000000e+00> : vector<16x16xf32>
    %80 = tpu.matmul %75, %77, %cst_23 {dimension_numbers = #tpu.dot_dimension_numbers<[1], [1], [0], [0], [0, 0, 1, 0], [], []>} : vector<16x8xbf16>, vector<16x8xbf16>, vector<16x16xf32> -> vector<16x16xf32>
    %cst_24 = arith.constant 0.353553385 : f32
    %81 = vector.broadcast %cst_24 : f32 to vector<16x16xf32>
    %82 = arith.mulf %80, %81 : vector<16x16xf32>
    %cst_25 = arith.constant dense<0xFF800000> : vector<16xf32>
    %83 = vector.multi_reduction <maximumf>, %82, %cst_25 [1] : vector<16x16xf32> to vector<16xf32>
    %84 = vector.shape_cast %83 : vector<16xf32> to vector<16x1xf32>
    %85 = vector.broadcast %84 : vector<16x1xf32> to vector<16x16xf32>
    %86 = arith.subf %82, %85 : vector<16x16xf32>
    %87 = math.exp %86 : vector<16x16xf32>
    %cst_26 = arith.constant dense<0.000000e+00> : vector<16xf32>
    %88 = vector.multi_reduction <add>, %87, %cst_26 [1] : vector<16x16xf32> to vector<16xf32>
    %89 = vector.shape_cast %88 : vector<16xf32> to vector<16x1xf32>
    %90 = tpu.reciprocal %89 {approx = true} : vector<16x1xf32> -> vector<16x1xf32>
    %91 = vector.broadcast %90 : vector<16x1xf32> to vector<16x16xf32>
    %92 = arith.mulf %87, %91 : vector<16x16xf32>
    %93 = arith.truncf %92 : vector<16x16xf32> to vector<16x16xbf16>
    %cst_27 = arith.constant dense<0.000000e+00> : vector<16x8xf32>
    %94 = tpu.matmul %93, %79, %cst_27 {dimension_numbers = #tpu.dot_dimension_numbers<[1], [0], [0], [1], [0, 0, 1, 1], [], []>} : vector<16x16xbf16>, vector<16x8xbf16>, vector<16x8xf32> -> vector<16x8xf32>
    %95 = vector.extract_strided_slice %29 {offsets = [0, 24], sizes = [16, 8], strides = [1, 1]} : vector<16x32xf32> to vector<16x8xf32>
    %96 = arith.truncf %95 : vector<16x8xf32> to vector<16x8xbf16>
    %97 = vector.extract_strided_slice %30 {offsets = [0, 24], sizes = [16, 8], strides = [1, 1]} : vector<16x32xf32> to vector<16x8xf32>
    %98 = arith.truncf %97 : vector<16x8xf32> to vector<16x8xbf16>
    %99 = vector.extract_strided_slice %31 {offsets = [0, 24], sizes = [16, 8], strides = [1, 1]} : vector<16x32xf32> to vector<16x8xf32>
    %100 = arith.truncf %99 : vector<16x8xf32> to vector<16x8xbf16>
    %cst_28 = arith.constant dense<0.000000e+00> : vector<16x16xf32>
    %101 = tpu.matmul %96, %98, %cst_28 {dimension_numbers = #tpu.dot_dimension_numbers<[1], [1], [0], [0], [0, 0, 1, 0], [], []>} : vector<16x8xbf16>, vector<16x8xbf16>, vector<16x16xf32> -> vector<16x16xf32>
    %cst_29 = arith.constant 0.353553385 : f32
    %102 = vector.broadcast %cst_29 : f32 to vector<16x16xf32>
    %103 = arith.mulf %101, %102 : vector<16x16xf32>
    %cst_30 = arith.constant dense<0xFF800000> : vector<16xf32>
    %104 = vector.multi_reduction <maximumf>, %103, %cst_30 [1] : vector<16x16xf32> to vector<16xf32>
    %105 = vector.shape_cast %104 : vector<16xf32> to vector<16x1xf32>
    %106 = vector.broadcast %105 : vector<16x1xf32> to vector<16x16xf32>
    %107 = arith.subf %103, %106 : vector<16x16xf32>
    %108 = math.exp %107 : vector<16x16xf32>
    %cst_31 = arith.constant dense<0.000000e+00> : vector<16xf32>
    %109 = vector.multi_reduction <add>, %108, %cst_31 [1] : vector<16x16xf32> to vector<16xf32>
    %110 = vector.shape_cast %109 : vector<16xf32> to vector<16x1xf32>
    %111 = tpu.reciprocal %110 {approx = true} : vector<16x1xf32> -> vector<16x1xf32>
    %112 = vector.broadcast %111 : vector<16x1xf32> to vector<16x16xf32>
    %113 = arith.mulf %108, %112 : vector<16x16xf32>
    %114 = arith.truncf %113 : vector<16x16xf32> to vector<16x16xbf16>
    %cst_32 = arith.constant dense<0.000000e+00> : vector<16x8xf32>
    %115 = tpu.matmul %114, %100, %cst_32 {dimension_numbers = #tpu.dot_dimension_numbers<[1], [0], [0], [1], [0, 0, 1, 1], [], []>} : vector<16x16xbf16>, vector<16x8xbf16>, vector<16x8xf32> -> vector<16x8xf32>
    %116 = tpu.concatenate %52, %73, %94, %115 in 1 : vector<16x8xf32>, vector<16x8xf32>, vector<16x8xf32>, vector<16x8xf32> -> vector<16x32xf32>
    %117 = arith.truncf %116 : vector<16x32xf32> to vector<16x32xbf16>
    %c0_33 = arith.constant 0 : index
    %c0_34 = arith.constant 0 : index
    %118 = vector.load %arg7[%c0_33, %c0_34] : memref<32x32xbf16, #tpu.memory_space<vmem>>, vector<32x32xbf16>
    %cst_35 = arith.constant dense<0.000000e+00> : vector<16x32xf32>
    %119 = tpu.matmul %117, %118, %cst_35 {dimension_numbers = #tpu.dot_dimension_numbers<[1], [0], [0], [1], [0, 0, 1, 1], [], []>} : vector<16x32xbf16>, vector<32x32xbf16>, vector<16x32xf32> -> vector<16x32xf32>
    %c0_36 = arith.constant 0 : index
    %c0_37 = arith.constant 0 : index
    %120 = vector.load %arg8[%c0_36, %c0_37] : memref<1x32xf32, #tpu.memory_space<vmem>>, vector<1x32xf32>
    %121 = vector.broadcast %120 : vector<1x32xf32> to vector<16x32xf32>
    %122 = arith.addf %119, %121 : vector<16x32xf32>
    %123 = arith.addf %1, %122 : vector<16x32xf32>
    %c0_38 = arith.constant 0 : index
    %c0_39 = arith.constant 0 : index
    %c0_40 = arith.constant 0 : index
    %124 = vector.load %arg2[%c0_38, %c0_39, %c0_40] : memref<1x8x32xf32, #tpu.memory_space<vmem>>, vector<1x8x32xf32>
    %125 = vector.shape_cast %124 : vector<1x8x32xf32> to vector<8x32xf32>
    %c0_41 = arith.constant 0 : index
    %c0_42 = arith.constant 0 : index
    %126 = vector.load %arg9[%c0_41, %c0_42] : memref<1x32xf32, #tpu.memory_space<vmem>>, vector<1x32xf32>
    %c0_43 = arith.constant 0 : index
    %c0_44 = arith.constant 0 : index
    %127 = vector.load %arg10[%c0_43, %c0_44] : memref<1x32xf32, #tpu.memory_space<vmem>>, vector<1x32xf32>
    %cst_45 = arith.constant dense<0.000000e+00> : vector<16xf32>
    %128 = vector.multi_reduction <add>, %123, %cst_45 [1] : vector<16x32xf32> to vector<16xf32>
    %129 = vector.shape_cast %128 : vector<16xf32> to vector<16x1xf32>
    %cst_46 = arith.constant 3.200000e+01 : f32
    %130 = vector.broadcast %cst_46 : f32 to vector<16x1xf32>
    %131 = arith.divf %129, %130 : vector<16x1xf32>
    %132 = vector.broadcast %131 : vector<16x1xf32> to vector<16x32xf32>
    %133 = arith.subf %123, %132 : vector<16x32xf32>
    %134 = arith.mulf %133, %133 : vector<16x32xf32>
    %cst_47 = arith.constant dense<0.000000e+00> : vector<16xf32>
    %135 = vector.multi_reduction <add>, %134, %cst_47 [1] : vector<16x32xf32> to vector<16xf32>
    %136 = vector.shape_cast %135 : vector<16xf32> to vector<16x1xf32>
    %cst_48 = arith.constant 3.200000e+01 : f32
    %137 = vector.broadcast %cst_48 : f32 to vector<16x1xf32>
    %138 = arith.divf %136, %137 : vector<16x1xf32>
    %139 = vector.broadcast %131 : vector<16x1xf32> to vector<16x32xf32>
    %140 = arith.subf %123, %139 : vector<16x32xf32>
    %cst_49 = arith.constant 9.99999974E-6 : f32
    %141 = vector.broadcast %cst_49 : f32 to vector<16x1xf32>
    %142 = arith.addf %138, %141 : vector<16x1xf32>
    %143 = math.rsqrt %142 : vector<16x1xf32>
    %144 = vector.broadcast %143 : vector<16x1xf32> to vector<16x32xf32>
    %145 = arith.mulf %140, %144 : vector<16x32xf32>
    %146 = vector.broadcast %126 : vector<1x32xf32> to vector<16x32xf32>
    %147 = arith.mulf %145, %146 : vector<16x32xf32>
    %148 = vector.broadcast %127 : vector<1x32xf32> to vector<16x32xf32>
    %149 = arith.addf %147, %148 : vector<16x32xf32>
    %150 = arith.truncf %149 : vector<16x32xf32> to vector<16x32xbf16>
    %c0_50 = arith.constant 0 : index
    %c0_51 = arith.constant 0 : index
    %151 = vector.load %arg11[%c0_50, %c0_51] : memref<32x32xbf16, #tpu.memory_space<vmem>>, vector<32x32xbf16>
    %cst_52 = arith.constant dense<0.000000e+00> : vector<16x32xf32>
    %152 = tpu.matmul %150, %151, %cst_52 {dimension_numbers = #tpu.dot_dimension_numbers<[1], [0], [0], [1], [0, 0, 1, 1], [], []>} : vector<16x32xbf16>, vector<32x32xbf16>, vector<16x32xf32> -> vector<16x32xf32>
    %153 = arith.truncf %125 : vector<8x32xf32> to vector<8x32xbf16>
    %c0_53 = arith.constant 0 : index
    %c0_54 = arith.constant 0 : index
    %154 = vector.load %arg12[%c0_53, %c0_54] : memref<32x64xbf16, #tpu.memory_space<vmem>>, vector<32x64xbf16>
    %cst_55 = arith.constant dense<0.000000e+00> : vector<8x64xf32>
    %155 = tpu.matmul %153, %154, %cst_55 {dimension_numbers = #tpu.dot_dimension_numbers<[1], [0], [0], [1], [0, 0, 1, 1], [], []>} : vector<8x32xbf16>, vector<32x64xbf16>, vector<8x64xf32> -> vector<8x64xf32>
    %156 = vector.extract_strided_slice %155 {offsets = [0, 0], sizes = [8, 32], strides = [1, 1]} : vector<8x64xf32> to vector<8x32xf32>
    %157 = vector.extract_strided_slice %155 {offsets = [0, 32], sizes = [8, 32], strides = [1, 1]} : vector<8x64xf32> to vector<8x32xf32>
    %158 = vector.extract_strided_slice %152 {offsets = [0, 0], sizes = [16, 8], strides = [1, 1]} : vector<16x32xf32> to vector<16x8xf32>
    %159 = arith.truncf %158 : vector<16x8xf32> to vector<16x8xbf16>
    %160 = vector.extract_strided_slice %156 {offsets = [0, 0], sizes = [8, 8], strides = [1, 1]} : vector<8x32xf32> to vector<8x8xf32>
    %161 = arith.truncf %160 : vector<8x8xf32> to vector<8x8xbf16>
    %162 = vector.extract_strided_slice %157 {offsets = [0, 0], sizes = [8, 8], strides = [1, 1]} : vector<8x32xf32> to vector<8x8xf32>
    %163 = arith.truncf %162 : vector<8x8xf32> to vector<8x8xbf16>
    %cst_56 = arith.constant dense<0.000000e+00> : vector<16x8xf32>
    %164 = tpu.matmul %159, %161, %cst_56 {dimension_numbers = #tpu.dot_dimension_numbers<[1], [1], [0], [0], [0, 0, 1, 0], [], []>} : vector<16x8xbf16>, vector<8x8xbf16>, vector<16x8xf32> -> vector<16x8xf32>
    %cst_57 = arith.constant 0.353553385 : f32
    %165 = vector.broadcast %cst_57 : f32 to vector<16x8xf32>
    %166 = arith.mulf %164, %165 : vector<16x8xf32>
    %cst_58 = arith.constant dense<0xFF800000> : vector<16xf32>
    %167 = vector.multi_reduction <maximumf>, %166, %cst_58 [1] : vector<16x8xf32> to vector<16xf32>
    %168 = vector.shape_cast %167 : vector<16xf32> to vector<16x1xf32>
    %169 = vector.broadcast %168 : vector<16x1xf32> to vector<16x8xf32>
    %170 = arith.subf %166, %169 : vector<16x8xf32>
    %171 = math.exp %170 : vector<16x8xf32>
    %cst_59 = arith.constant dense<0.000000e+00> : vector<16xf32>
    %172 = vector.multi_reduction <add>, %171, %cst_59 [1] : vector<16x8xf32> to vector<16xf32>
    %173 = vector.shape_cast %172 : vector<16xf32> to vector<16x1xf32>
    %174 = tpu.reciprocal %173 {approx = true} : vector<16x1xf32> -> vector<16x1xf32>
    %175 = vector.broadcast %174 : vector<16x1xf32> to vector<16x8xf32>
    %176 = arith.mulf %171, %175 : vector<16x8xf32>
    %177 = arith.truncf %176 : vector<16x8xf32> to vector<16x8xbf16>
    %cst_60 = arith.constant dense<0.000000e+00> : vector<16x8xf32>
    %178 = tpu.matmul %177, %163, %cst_60 {dimension_numbers = #tpu.dot_dimension_numbers<[1], [0], [0], [1], [0, 0, 1, 1], [], []>} : vector<16x8xbf16>, vector<8x8xbf16>, vector<16x8xf32> -> vector<16x8xf32>
    %179 = vector.extract_strided_slice %152 {offsets = [0, 8], sizes = [16, 8], strides = [1, 1]} : vector<16x32xf32> to vector<16x8xf32>
    %180 = arith.truncf %179 : vector<16x8xf32> to vector<16x8xbf16>
    %181 = vector.extract_strided_slice %156 {offsets = [0, 8], sizes = [8, 8], strides = [1, 1]} : vector<8x32xf32> to vector<8x8xf32>
    %182 = arith.truncf %181 : vector<8x8xf32> to vector<8x8xbf16>
    %183 = vector.extract_strided_slice %157 {offsets = [0, 8], sizes = [8, 8], strides = [1, 1]} : vector<8x32xf32> to vector<8x8xf32>
    %184 = arith.truncf %183 : vector<8x8xf32> to vector<8x8xbf16>
    %cst_61 = arith.constant dense<0.000000e+00> : vector<16x8xf32>
    %185 = tpu.matmul %180, %182, %cst_61 {dimension_numbers = #tpu.dot_dimension_numbers<[1], [1], [0], [0], [0, 0, 1, 0], [], []>} : vector<16x8xbf16>, vector<8x8xbf16>, vector<16x8xf32> -> vector<16x8xf32>
    %cst_62 = arith.constant 0.353553385 : f32
    %186 = vector.broadcast %cst_62 : f32 to vector<16x8xf32>
    %187 = arith.mulf %185, %186 : vector<16x8xf32>
    %188 = arith.addf %166, %187 : vector<16x8xf32>
    %cst_63 = arith.constant dense<0xFF800000> : vector<16xf32>
    %189 = vector.multi_reduction <maximumf>, %187, %cst_63 [1] : vector<16x8xf32> to vector<16xf32>
    %190 = vector.shape_cast %189 : vector<16xf32> to vector<16x1xf32>
    %191 = vector.broadcast %190 : vector<16x1xf32> to vector<16x8xf32>
    %192 = arith.subf %187, %191 : vector<16x8xf32>
    %193 = math.exp %192 : vector<16x8xf32>
    %cst_64 = arith.constant dense<0.000000e+00> : vector<16xf32>
    %194 = vector.multi_reduction <add>, %193, %cst_64 [1] : vector<16x8xf32> to vector<16xf32>
    %195 = vector.shape_cast %194 : vector<16xf32> to vector<16x1xf32>
    %196 = tpu.reciprocal %195 {approx = true} : vector<16x1xf32> -> vector<16x1xf32>
    %197 = vector.broadcast %196 : vector<16x1xf32> to vector<16x8xf32>
    %198 = arith.mulf %193, %197 : vector<16x8xf32>
    %199 = arith.truncf %198 : vector<16x8xf32> to vector<16x8xbf16>
    %cst_65 = arith.constant dense<0.000000e+00> : vector<16x8xf32>
    %200 = tpu.matmul %199, %184, %cst_65 {dimension_numbers = #tpu.dot_dimension_numbers<[1], [0], [0], [1], [0, 0, 1, 1], [], []>} : vector<16x8xbf16>, vector<8x8xbf16>, vector<16x8xf32> -> vector<16x8xf32>
    %201 = vector.extract_strided_slice %152 {offsets = [0, 16], sizes = [16, 8], strides = [1, 1]} : vector<16x32xf32> to vector<16x8xf32>
    %202 = arith.truncf %201 : vector<16x8xf32> to vector<16x8xbf16>
    %203 = vector.extract_strided_slice %156 {offsets = [0, 16], sizes = [8, 8], strides = [1, 1]} : vector<8x32xf32> to vector<8x8xf32>
    %204 = arith.truncf %203 : vector<8x8xf32> to vector<8x8xbf16>
    %205 = vector.extract_strided_slice %157 {offsets = [0, 16], sizes = [8, 8], strides = [1, 1]} : vector<8x32xf32> to vector<8x8xf32>
    %206 = arith.truncf %205 : vector<8x8xf32> to vector<8x8xbf16>
    %cst_66 = arith.constant dense<0.000000e+00> : vector<16x8xf32>
    %207 = tpu.matmul %202, %204, %cst_66 {dimension_numbers = #tpu.dot_dimension_numbers<[1], [1], [0], [0], [0, 0, 1, 0], [], []>} : vector<16x8xbf16>, vector<8x8xbf16>, vector<16x8xf32> -> vector<16x8xf32>
    %cst_67 = arith.constant 0.353553385 : f32
    %208 = vector.broadcast %cst_67 : f32 to vector<16x8xf32>
    %209 = arith.mulf %207, %208 : vector<16x8xf32>
    %210 = arith.addf %188, %209 : vector<16x8xf32>
    %cst_68 = arith.constant dense<0xFF800000> : vector<16xf32>
    %211 = vector.multi_reduction <maximumf>, %209, %cst_68 [1] : vector<16x8xf32> to vector<16xf32>
    %212 = vector.shape_cast %211 : vector<16xf32> to vector<16x1xf32>
    %213 = vector.broadcast %212 : vector<16x1xf32> to vector<16x8xf32>
    %214 = arith.subf %209, %213 : vector<16x8xf32>
    %215 = math.exp %214 : vector<16x8xf32>
    %cst_69 = arith.constant dense<0.000000e+00> : vector<16xf32>
    %216 = vector.multi_reduction <add>, %215, %cst_69 [1] : vector<16x8xf32> to vector<16xf32>
    %217 = vector.shape_cast %216 : vector<16xf32> to vector<16x1xf32>
    %218 = tpu.reciprocal %217 {approx = true} : vector<16x1xf32> -> vector<16x1xf32>
    %219 = vector.broadcast %218 : vector<16x1xf32> to vector<16x8xf32>
    %220 = arith.mulf %215, %219 : vector<16x8xf32>
    %221 = arith.truncf %220 : vector<16x8xf32> to vector<16x8xbf16>
    %cst_70 = arith.constant dense<0.000000e+00> : vector<16x8xf32>
    %222 = tpu.matmul %221, %206, %cst_70 {dimension_numbers = #tpu.dot_dimension_numbers<[1], [0], [0], [1], [0, 0, 1, 1], [], []>} : vector<16x8xbf16>, vector<8x8xbf16>, vector<16x8xf32> -> vector<16x8xf32>
    %223 = vector.extract_strided_slice %152 {offsets = [0, 24], sizes = [16, 8], strides = [1, 1]} : vector<16x32xf32> to vector<16x8xf32>
    %224 = arith.truncf %223 : vector<16x8xf32> to vector<16x8xbf16>
    %225 = vector.extract_strided_slice %156 {offsets = [0, 24], sizes = [8, 8], strides = [1, 1]} : vector<8x32xf32> to vector<8x8xf32>
    %226 = arith.truncf %225 : vector<8x8xf32> to vector<8x8xbf16>
    %227 = vector.extract_strided_slice %157 {offsets = [0, 24], sizes = [8, 8], strides = [1, 1]} : vector<8x32xf32> to vector<8x8xf32>
    %228 = arith.truncf %227 : vector<8x8xf32> to vector<8x8xbf16>
    %cst_71 = arith.constant dense<0.000000e+00> : vector<16x8xf32>
    %229 = tpu.matmul %224, %226, %cst_71 {dimension_numbers = #tpu.dot_dimension_numbers<[1], [1], [0], [0], [0, 0, 1, 0], [], []>} : vector<16x8xbf16>, vector<8x8xbf16>, vector<16x8xf32> -> vector<16x8xf32>
    %cst_72 = arith.constant 0.353553385 : f32
    %230 = vector.broadcast %cst_72 : f32 to vector<16x8xf32>
    %231 = arith.mulf %229, %230 : vector<16x8xf32>
    %232 = arith.addf %210, %231 : vector<16x8xf32>
    %cst_73 = arith.constant dense<0xFF800000> : vector<16xf32>
    %233 = vector.multi_reduction <maximumf>, %231, %cst_73 [1] : vector<16x8xf32> to vector<16xf32>
    %234 = vector.shape_cast %233 : vector<16xf32> to vector<16x1xf32>
    %235 = vector.broadcast %234 : vector<16x1xf32> to vector<16x8xf32>
    %236 = arith.subf %231, %235 : vector<16x8xf32>
    %237 = math.exp %236 : vector<16x8xf32>
    %cst_74 = arith.constant dense<0.000000e+00> : vector<16xf32>
    %238 = vector.multi_reduction <add>, %237, %cst_74 [1] : vector<16x8xf32> to vector<16xf32>
    %239 = vector.shape_cast %238 : vector<16xf32> to vector<16x1xf32>
    %240 = tpu.reciprocal %239 {approx = true} : vector<16x1xf32> -> vector<16x1xf32>
    %241 = vector.broadcast %240 : vector<16x1xf32> to vector<16x8xf32>
    %242 = arith.mulf %237, %241 : vector<16x8xf32>
    %243 = arith.truncf %242 : vector<16x8xf32> to vector<16x8xbf16>
    %cst_75 = arith.constant dense<0.000000e+00> : vector<16x8xf32>
    %244 = tpu.matmul %243, %228, %cst_75 {dimension_numbers = #tpu.dot_dimension_numbers<[1], [0], [0], [1], [0, 0, 1, 1], [], []>} : vector<16x8xbf16>, vector<8x8xbf16>, vector<16x8xf32> -> vector<16x8xf32>
    %245 = tpu.concatenate %178, %200, %222, %244 in 1 : vector<16x8xf32>, vector<16x8xf32>, vector<16x8xf32>, vector<16x8xf32> -> vector<16x32xf32>
    %246 = arith.truncf %245 : vector<16x32xf32> to vector<16x32xbf16>
    %c0_76 = arith.constant 0 : index
    %c0_77 = arith.constant 0 : index
    %247 = vector.load %arg13[%c0_76, %c0_77] : memref<32x32xbf16, #tpu.memory_space<vmem>>, vector<32x32xbf16>
    %cst_78 = arith.constant dense<0.000000e+00> : vector<16x32xf32>
    %248 = tpu.matmul %246, %247, %cst_78 {dimension_numbers = #tpu.dot_dimension_numbers<[1], [0], [0], [1], [0, 0, 1, 1], [], []>} : vector<16x32xbf16>, vector<32x32xbf16>, vector<16x32xf32> -> vector<16x32xf32>
    %c0_79 = arith.constant 0 : index
    %c0_80 = arith.constant 0 : index
    %249 = vector.load %arg14[%c0_79, %c0_80] : memref<1x32xf32, #tpu.memory_space<vmem>>, vector<1x32xf32>
    %250 = vector.broadcast %249 : vector<1x32xf32> to vector<16x32xf32>
    %251 = arith.addf %248, %250 : vector<16x32xf32>
    %252 = arith.addf %123, %251 : vector<16x32xf32>
    %cst_81 = arith.constant 2.500000e-01 : f32
    %253 = vector.broadcast %cst_81 : f32 to vector<16x8xf32>
    %254 = arith.mulf %232, %253 : vector<16x8xf32>
    %c0_82 = arith.constant 0 : index
    %c0_83 = arith.constant 0 : index
    %c0_84 = arith.constant 0 : index
    %255 = vector.load %arg3[%c0_82, %c0_83, %c0_84] : memref<1x16x8xf32, #tpu.memory_space<vmem>>, vector<1x16x8xf32>
    %256 = vector.shape_cast %255 : vector<1x16x8xf32> to vector<16x8xf32>
    %cst_85 = arith.constant 0.000000e+00 : f32
    %257 = vector.broadcast %cst_85 : f32 to vector<16x8xf32>
    %258 = arith.maximumf %254, %257 : vector<16x8xf32>
    %259 = arith.mulf %254, %256 : vector<16x8xf32>
    %260 = arith.subf %258, %259 : vector<16x8xf32>
    %261 = math.absf %254 : vector<16x8xf32>
    %cst_86 = arith.constant 0.000000e+00 : f32
    %262 = vector.broadcast %cst_86 : f32 to vector<16x8xf32>
    %263 = arith.subf %262, %261 : vector<16x8xf32>
    %264 = math.exp %263 : vector<16x8xf32>
    %cst_87 = arith.constant 1.000000e+00 : f32
    %265 = vector.broadcast %cst_87 : f32 to vector<16x8xf32>
    %266 = arith.addf %265, %264 : vector<16x8xf32>
    %267 = math.log %266 : vector<16x8xf32>
    %268 = arith.addf %260, %267 : vector<16x8xf32>
    %269 = vector.shape_cast %268 : vector<16x8xf32> to vector<1x16x8xf32>
    %cst_88 = arith.constant dense<0.000000e+00> : vector<1xf32>
    %270 = vector.multi_reduction <add>, %269, %cst_88 [1, 2] : vector<1x16x8xf32> to vector<1xf32>
    %271 = vector.shape_cast %270 : vector<1xf32> to vector<1x1x1xf32>
    %272 = vector.extract %271[0, 0, 0] : f32 from vector<1x1x1xf32>
    %273 = vector.broadcast %272 : f32 to vector<1x1xf32>
    %c0_89 = arith.constant 0 : index
    %c0_90 = arith.constant 0 : index
    %c0_91 = arith.constant 0 : index
    %274 = vector.load %arg24[%c0_89, %c0_90, %c0_91] : memref<1x1x1xf32, #tpu.memory_space<vmem>>, vector<1x1x1xf32>
    %275 = vector.shape_cast %274 : vector<1x1x1xf32> to vector<1x1xf32>
    %276 = vector.shape_cast %273 : vector<1x1xf32> to vector<1x1x1xf32>
    tpu.vector_store %arg24[%c0_89, %c0_90, %c0_91], %276 {strides = array<i32>} : memref<1x1x1xf32, #tpu.memory_space<vmem>>, vector<1x1x1xf32>,
    %c0_92 = arith.constant 0 : index
    %c0_93 = arith.constant 0 : index
    %277 = vector.load %arg15[%c0_92, %c0_93] : memref<1x32xf32, #tpu.memory_space<vmem>>, vector<1x32xf32>
    %c0_94 = arith.constant 0 : index
    %c0_95 = arith.constant 0 : index
    %278 = vector.load %arg16[%c0_94, %c0_95] : memref<1x32xf32, #tpu.memory_space<vmem>>, vector<1x32xf32>
    %cst_96 = arith.constant dense<0.000000e+00> : vector<16xf32>
    %279 = vector.multi_reduction <add>, %252, %cst_96 [1] : vector<16x32xf32> to vector<16xf32>
    %280 = vector.shape_cast %279 : vector<16xf32> to vector<16x1xf32>
    %cst_97 = arith.constant 3.200000e+01 : f32
    %281 = vector.broadcast %cst_97 : f32 to vector<16x1xf32>
    %282 = arith.divf %280, %281 : vector<16x1xf32>
    %283 = vector.broadcast %282 : vector<16x1xf32> to vector<16x32xf32>
    %284 = arith.subf %252, %283 : vector<16x32xf32>
    %285 = arith.mulf %284, %284 : vector<16x32xf32>
    %cst_98 = arith.constant dense<0.000000e+00> : vector<16xf32>
    %286 = vector.multi_reduction <add>, %285, %cst_98 [1] : vector<16x32xf32> to vector<16xf32>
    %287 = vector.shape_cast %286 : vector<16xf32> to vector<16x1xf32>
    %cst_99 = arith.constant 3.200000e+01 : f32
    %288 = vector.broadcast %cst_99 : f32 to vector<16x1xf32>
    %289 = arith.divf %287, %288 : vector<16x1xf32>
    %290 = vector.broadcast %282 : vector<16x1xf32> to vector<16x32xf32>
    %291 = arith.subf %252, %290 : vector<16x32xf32>
    %cst_100 = arith.constant 9.99999974E-6 : f32
    %292 = vector.broadcast %cst_100 : f32 to vector<16x1xf32>
    %293 = arith.addf %289, %292 : vector<16x1xf32>
    %294 = math.rsqrt %293 : vector<16x1xf32>
    %295 = vector.broadcast %294 : vector<16x1xf32> to vector<16x32xf32>
    %296 = arith.mulf %291, %295 : vector<16x32xf32>
    %297 = vector.broadcast %277 : vector<1x32xf32> to vector<16x32xf32>
    %298 = arith.mulf %296, %297 : vector<16x32xf32>
    %299 = vector.broadcast %278 : vector<1x32xf32> to vector<16x32xf32>
    %300 = arith.addf %298, %299 : vector<16x32xf32>
    %301 = arith.truncf %300 : vector<16x32xf32> to vector<16x32xbf16>
    %c0_101 = arith.constant 0 : index
    %c0_102 = arith.constant 0 : index
    %302 = vector.load %arg17[%c0_101, %c0_102] : memref<32x128xbf16, #tpu.memory_space<vmem>>, vector<32x128xbf16>
    %cst_103 = arith.constant dense<0.000000e+00> : vector<16x128xf32>
    %303 = tpu.matmul %301, %302, %cst_103 {dimension_numbers = #tpu.dot_dimension_numbers<[1], [0], [0], [1], [0, 0, 1, 1], [], []>} : vector<16x32xbf16>, vector<32x128xbf16>, vector<16x128xf32> -> vector<16x128xf32>
    %c0_104 = arith.constant 0 : index
    %c0_105 = arith.constant 0 : index
    %304 = vector.load %arg18[%c0_104, %c0_105] : memref<1x128xf32, #tpu.memory_space<vmem>>, vector<1x128xf32>
    %305 = vector.broadcast %304 : vector<1x128xf32> to vector<16x128xf32>
    %306 = arith.addf %303, %305 : vector<16x128xf32>
    %c0_106 = arith.constant 0 : index
    %c0_107 = arith.constant 0 : index
    %307 = vector.load %arg19[%c0_106, %c0_107] : memref<32x128xbf16, #tpu.memory_space<vmem>>, vector<32x128xbf16>
    %cst_108 = arith.constant dense<0.000000e+00> : vector<16x128xf32>
    %308 = tpu.matmul %301, %307, %cst_108 {dimension_numbers = #tpu.dot_dimension_numbers<[1], [0], [0], [1], [0, 0, 1, 1], [], []>} : vector<16x32xbf16>, vector<32x128xbf16>, vector<16x128xf32> -> vector<16x128xf32>
    %c0_109 = arith.constant 0 : index
    %c0_110 = arith.constant 0 : index
    %309 = vector.load %arg20[%c0_109, %c0_110] : memref<1x128xf32, #tpu.memory_space<vmem>>, vector<1x128xf32>
    %310 = vector.broadcast %309 : vector<1x128xf32> to vector<16x128xf32>
    %311 = arith.addf %308, %310 : vector<16x128xf32>
    %cst_111 = arith.constant 5.000000e-01 : f32
    %312 = vector.broadcast %cst_111 : f32 to vector<16x128xf32>
    %313 = arith.mulf %312, %311 : vector<16x128xf32>
    %cst_112 = arith.constant 0.707106769 : f32
    %314 = vector.broadcast %cst_112 : f32 to vector<16x128xf32>
    %315 = arith.mulf %311, %314 : vector<16x128xf32>
    %316 = math.erf %315 : vector<16x128xf32>
    %cst_113 = arith.constant 1.000000e+00 : f32
    %317 = vector.broadcast %cst_113 : f32 to vector<16x128xf32>
    %318 = arith.addf %317, %316 : vector<16x128xf32>
    %319 = arith.mulf %313, %318 : vector<16x128xf32>
    %320 = arith.mulf %306, %319 : vector<16x128xf32>
    %321 = arith.truncf %320 : vector<16x128xf32> to vector<16x128xbf16>
    %c0_114 = arith.constant 0 : index
    %c0_115 = arith.constant 0 : index
    %322 = vector.load %arg21[%c0_114, %c0_115] : memref<128x32xbf16, #tpu.memory_space<vmem>>, vector<128x32xbf16>
    %cst_116 = arith.constant dense<0.000000e+00> : vector<16x32xf32>
    %323 = tpu.matmul %321, %322, %cst_116 {dimension_numbers = #tpu.dot_dimension_numbers<[1], [0], [0], [1], [0, 0, 1, 1], [], []>} : vector<16x128xbf16>, vector<128x32xbf16>, vector<16x32xf32> -> vector<16x32xf32>
    %c0_117 = arith.constant 0 : index
    %c0_118 = arith.constant 0 : index
    %324 = vector.load %arg22[%c0_117, %c0_118] : memref<1x32xf32, #tpu.memory_space<vmem>>, vector<1x32xf32>
    %325 = vector.broadcast %324 : vector<1x32xf32> to vector<16x32xf32>
    %326 = arith.addf %323, %325 : vector<16x32xf32>
    %327 = arith.addf %252, %326 : vector<16x32xf32>
    %c0_119 = arith.constant 0 : index
    %c0_120 = arith.constant 0 : index
    %c0_121 = arith.constant 0 : index
    %328 = vector.load %arg23[%c0_119, %c0_120, %c0_121] : memref<1x16x32xf32, #tpu.memory_space<vmem>>, vector<1x16x32xf32>
    %329 = vector.shape_cast %328 : vector<1x16x32xf32> to vector<16x32xf32>
    %330 = vector.shape_cast %327 : vector<16x32xf32> to vector<1x16x32xf32>
    tpu.vector_store %arg23[%c0_119, %c0_120, %c0_121], %330 {strides = array<i32>} : memref<1x16x32xf32, #tpu.memory_space<vmem>>, vector<1x16x32xf32>,
    return
  }
  func.func @transform_0(%arg0: i32) -> (i32, i32, i32) {
    %c0_i32 = arith.constant 0 : i32
    %c0_i32_0 = arith.constant 0 : i32
    %c0_i32_1 = arith.constant 0 : i32
    return %arg0, %c0_i32, %c0_i32_0 : i32, i32, i32
  }
  func.func @transform_1(%arg0: i32) -> (i32, i32, i32) {
    %c0_i32 = arith.constant 0 : i32
    %c0_i32_0 = arith.constant 0 : i32
    %c0_i32_1 = arith.constant 0 : i32
    return %arg0, %c0_i32, %c0_i32_0 : i32, i32, i32
  }
  func.func @transform_2(%arg0: i32) -> (i32, i32, i32) {
    %c0_i32 = arith.constant 0 : i32
    %c0_i32_0 = arith.constant 0 : i32
    %c0_i32_1 = arith.constant 0 : i32
    return %arg0, %c0_i32, %c0_i32_0 : i32, i32, i32
  }
  func.func @transform_3(%arg0: i32) -> (i32, i32) {
    %c0_i32 = arith.constant 0 : i32
    %c0_i32_0 = arith.constant 0 : i32
    %c0_i32_1 = arith.constant 0 : i32
    return %c0_i32, %c0_i32_0 : i32, i32
  }
  func.func @transform_4(%arg0: i32) -> (i32, i32) {
    %c0_i32 = arith.constant 0 : i32
    %c0_i32_0 = arith.constant 0 : i32
    %c0_i32_1 = arith.constant 0 : i32
    return %c0_i32, %c0_i32_0 : i32, i32
  }
  func.func @transform_5(%arg0: i32) -> (i32, i32) {
    %c0_i32 = arith.constant 0 : i32
    %c0_i32_0 = arith.constant 0 : i32
    %c0_i32_1 = arith.constant 0 : i32
    return %c0_i32, %c0_i32_0 : i32, i32
  }
  func.func @transform_6(%arg0: i32) -> (i32, i32) {
    %c0_i32 = arith.constant 0 : i32
    %c0_i32_0 = arith.constant 0 : i32
    %c0_i32_1 = arith.constant 0 : i32
    return %c0_i32, %c0_i32_0 : i32, i32
  }
  func.func @transform_7(%arg0: i32) -> (i32, i32) {
    %c0_i32 = arith.constant 0 : i32
    %c0_i32_0 = arith.constant 0 : i32
    %c0_i32_1 = arith.constant 0 : i32
    return %c0_i32, %c0_i32_0 : i32, i32
  }
  func.func @transform_8(%arg0: i32) -> (i32, i32) {
    %c0_i32 = arith.constant 0 : i32
    %c0_i32_0 = arith.constant 0 : i32
    %c0_i32_1 = arith.constant 0 : i32
    return %c0_i32, %c0_i32_0 : i32, i32
  }
  func.func @transform_9(%arg0: i32) -> (i32, i32) {
    %c0_i32 = arith.constant 0 : i32
    %c0_i32_0 = arith.constant 0 : i32
    %c0_i32_1 = arith.constant 0 : i32
    return %c0_i32, %c0_i32_0 : i32, i32
  }
  func.func @transform_10(%arg0: i32) -> (i32, i32) {
    %c0_i32 = arith.constant 0 : i32
    %c0_i32_0 = arith.constant 0 : i32
    %c0_i32_1 = arith.constant 0 : i32
    return %c0_i32, %c0_i32_0 : i32, i32
  }
  func.func @transform_11(%arg0: i32) -> (i32, i32) {
    %c0_i32 = arith.constant 0 : i32
    %c0_i32_0 = arith.constant 0 : i32
    %c0_i32_1 = arith.constant 0 : i32
    return %c0_i32, %c0_i32_0 : i32, i32
  }
  func.func @transform_12(%arg0: i32) -> (i32, i32) {
    %c0_i32 = arith.constant 0 : i32
    %c0_i32_0 = arith.constant 0 : i32
    %c0_i32_1 = arith.constant 0 : i32
    return %c0_i32, %c0_i32_0 : i32, i32
  }
  func.func @transform_13(%arg0: i32) -> (i32, i32) {
    %c0_i32 = arith.constant 0 : i32
    %c0_i32_0 = arith.constant 0 : i32
    %c0_i32_1 = arith.constant 0 : i32
    return %c0_i32, %c0_i32_0 : i32, i32
  }
  func.func @transform_14(%arg0: i32) -> (i32, i32) {
    %c0_i32 = arith.constant 0 : i32
    %c0_i32_0 = arith.constant 0 : i32
    %c0_i32_1 = arith.constant 0 : i32
    return %c0_i32, %c0_i32_0 : i32, i32
  }
  func.func @transform_15(%arg0: i32) -> (i32, i32) {
    %c0_i32 = arith.constant 0 : i32
    %c0_i32_0 = arith.constant 0 : i32
    %c0_i32_1 = arith.constant 0 : i32
    return %c0_i32, %c0_i32_0 : i32, i32
  }
  func.func @transform_16(%arg0: i32) -> (i32, i32) {
    %c0_i32 = arith.constant 0 : i32
    %c0_i32_0 = arith.constant 0 : i32
    %c0_i32_1 = arith.constant 0 : i32
    return %c0_i32, %c0_i32_0 : i32, i32
  }
  func.func @transform_17(%arg0: i32) -> (i32, i32) {
    %c0_i32 = arith.constant 0 : i32
    %c0_i32_0 = arith.constant 0 : i32
    %c0_i32_1 = arith.constant 0 : i32
    return %c0_i32, %c0_i32_0 : i32, i32
  }
  func.func @transform_18(%arg0: i32) -> (i32, i32) {
    %c0_i32 = arith.constant 0 : i32
    %c0_i32_0 = arith.constant 0 : i32
    %c0_i32_1 = arith.constant 0 : i32
    return %c0_i32, %c0_i32_0 : i32, i32
  }
  func.func @transform_19(%arg0: i32) -> (i32, i32) {
    %c0_i32 = arith.constant 0 : i32
    %c0_i32_0 = arith.constant 0 : i32
    %c0_i32_1 = arith.constant 0 : i32
    return %c0_i32, %c0_i32_0 : i32, i32
  }
  func.func @transform_20(%arg0: i32) -> (i32, i32) {
    %c0_i32 = arith.constant 0 : i32
    %c0_i32_0 = arith.constant 0 : i32
    %c0_i32_1 = arith.constant 0 : i32
    return %c0_i32, %c0_i32_0 : i32, i32
  }
  func.func @transform_21(%arg0: i32) -> (i32, i32) {
    %c0_i32 = arith.constant 0 : i32
    %c0_i32_0 = arith.constant 0 : i32
    %c0_i32_1 = arith.constant 0 : i32
    return %c0_i32, %c0_i32_0 : i32, i32
  }
  func.func @transform_22(%arg0: i32) -> (i32, i32, i32) {
    %c0_i32 = arith.constant 0 : i32
    %c0_i32_0 = arith.constant 0 : i32
    %c0_i32_1 = arith.constant 0 : i32
    return %arg0, %c0_i32, %c0_i32_0 : i32, i32, i32
  }
  func.func @transform_23(%arg0: i32) -> (i32, i32, i32) {
    %c0_i32 = arith.constant 0 : i32
    %c0_i32_0 = arith.constant 0 : i32
    %c0_i32_1 = arith.constant 0 : i32
    return %arg0, %c0_i32, %c0_i32_0 : i32, i32, i32
  }
}

</mosaic_0001>

<bundles_post_ra>
// kernel: basic_transformer_block.1
= control target key start
LH: loop header
LB: loop body
LE: loop exit
PB: predicated region body
PF: predicated region fallthrough
CT: control target
= control target key end

     0   :  { %s3952_s0 = inlined_call_operand.vmem [shape: f32[2,16,32], index: 0, kind: input, shape index: {}]   ;;  %s3953_s1 = inlined_call_operand.vmem [shape: f32[2,8,32], index: 1, kind: input, shape index: {}]   ;;  %s3954_s2 = inlined_call_operand.vmem [shape: f32[2,16,8], index: 2, kind: input, shape index: {}]   ;;  %s3955_s3 = inlined_call_operand.vmem [shape: f32[1,32], index: 3, kind: input, shape index: {}]   ;;  %s3956_s4 = inlined_call_operand.vmem [shape: f32[1,32], index: 4, kind: input, shape index: {}]   ;;  %s3957_s5 = inlined_call_operand.vmem [shape: bf16[32,96], index: 5, kind: input, shape index: {}]   ;;  %s3958_s6 = inlined_call_operand.vmem [shape: bf16[32,32], index: 6, kind: input, shape index: {}]   ;;  %s3959_s7 = inlined_call_operand.vmem [shape: f32[1,32], index: 7, kind: input, shape index: {}]   ;;  %s3960_s8 = inlined_call_operand.vmem [shape: f32[1,32], index: 8, kind: input, shape index: {}]   ;;  %s3961_s9 = inlined_call_operand.vmem [shape: f32[1,32], index: 9, kind: input, shape index: {}]   ;;  %s3962_s10 = inlined_call_operand.vmem [shape: bf16[32,32], index: 10, kind: input, shape index: {}]   ;;  %s3963_s11 = inlined_call_operand.vmem [shape: bf16[32,64], index: 11, kind: input, shape index: {}]   ;;  %s3964_s12 = inlined_call_operand.vmem [shape: bf16[32,32], index: 12, kind: input, shape index: {}]   ;;  %s3965_s13 = inlined_call_operand.vmem [shape: f32[1,32], index: 13, kind: input, shape index: {}]   ;;  %s3966_s14 = inlined_call_operand.vmem [shape: f32[1,32], index: 14, kind: input, shape index: {}]   ;;  %s3967_s15 = inlined_call_operand.vmem [shape: f32[1,32], index: 15, kind: input, shape index: {}]   ;;  %s3968_s16 = inlined_call_operand.vmem [shape: bf16[32,128], index: 16, kind: input, shape index: {}]   ;;  %s3969_s17 = inlined_call_operand.vmem [shape: f32[1,128], index: 17, kind: input, shape index: {}]   ;;  %s3970_s18 = inlined_call_operand.vmem [shape: bf16[32,128], index: 18, kind: input, shape index: {}]   ;;  %s3971_s19 = inlined_call_operand.vmem [shape: f32[1,128], index: 19, kind: input, shape index: {}]   ;;  %s3972_s20 = inlined_call_operand.vmem [shape: bf16[128,32], index: 20, kind: input, shape index: {}]   ;;  %s3973_s21 = inlined_call_operand.vmem [shape: f32[1,32], index: 21, kind: input, shape index: {}]   ;;  %s3974_s22 = inlined_call_operand.hbm [shape: f32[2,16,32], index: 22, kind: output, shape index: {0}]   ;;  %s3975_s23 = inlined_call_operand.vmem [shape: f32[2,1,1], index: 23, kind: output, shape index: {1}]  }
   0x1   :  { %4001 = sst [smem:[#allocation11_spill]] %s3952_s0 }
   0x2   :  { %4002 = sst [smem:[#allocation12_spill]] %s3953_s1 }
   0x3   :  { %4003 = sst [smem:[#allocation13_spill]] %s3954_s2 }
   0x4   :  { %4004 = sst [smem:[#allocation14_spill]] %s3955_s3 }
   0x5   :  { %4005 = sst [smem:[#allocation15_spill]] %s3956_s4 }
   0x6   :  { %4006 = sst [smem:[#allocation16_spill]] %s3957_s5 }
   0x7   :  { %4007 = sst [smem:[#allocation17_spill]] %s3958_s6 }
   0x8   :  { %4008 = sst [smem:[#allocation18_spill]] %s3959_s7 }
   0x9   :  { %29 = vsyncpa [#allocation3], 0 }
   0xa   :  { %31 = vsyncpa [#allocation3 + $0x1], 0  ;;  %s3410_s4 = smov 0   ;;  %s3412_s30 = smov 0  }
   0xb   :  { %s3414_s24 = smov 0   ;;  %s3416_s25 = smov 0  }
   0xc LB: > { %4009 = sst [smem:[#allocation5_spill]] %s3258_s4  ;;  %s3431_s5 = sadd.s32 4294967295, %s3270_s25   ;;  %s3270_s25 = sphi %s3416_s25, %s4039_s25   ;;  %s3266_s24 = sphi %s3414_s24, %s4041_s24   ;;  %s3262_s30 = sphi %s3412_s30, %s4043_s30   ;;  %s3258_s4 = sphi %s3410_s4, %s4042_s4  }
   0xd   : > { %4010 = sst [smem:[#allocation6_spill]] %s3266_s24  ;;  %s2704_s1 = sadd.s32 4294967294, %s3270_s25  }
   0xe   : > { %4011 = sst [smem:[#allocation7_spill]] %s3270_s25  ;;  %s3435_s26 = sadd.s32 1, %s3270_s25  }
   0xf   : > { %4012 = sst [smem:[#allocation8_spill]] %s3435_s26  ;;  %s521_s2 = sadd.s32 1, %s3266_s24 }
  0x10   : > { %s518_s6 = ssub.s32 %s3270_s25, %s3435_s26  ;;  %p531_p0 = scmp.ne.s32.totalorder %s3266_s24, %s3262_s30 }
  0x11   : > { %p519_p1 = scmp.eq.s32.totalorder %s518_s6, 0  ;;  %p532_p2 = scmp.eq.s32.totalorder %s3431_s5, 1 }
  0x12   : > { %p537_p3 = scmp.ne.s32.totalorder %s3262_s30, %s3258_s4  ;;  %p538_p4 = scmp.eq.s32.totalorder %s2704_s1, 1 }
  0x13   : > { %s3446_s27 = scalar_select %p519_p1, %s3266_s24, %s521_s2  }
  0x14   : > { %p3448_p5 = por %p532_p2, %p531_p0  ;;  %p3452_p6 = por %p538_p4, %p537_p3 }
  0x15   : > { %4013 = sst [smem:[#allocation9_spill]] %s3446_s27  ;;  %p2707_p7 = scmp.ge.s32.totalorder %s3270_s25, 1 }
  0x16   : > { %s4015_s28 = scalar_select %p3452_p6, 1, 0 }
  0x17   : > { %p662_p8 = scmp.lt.s32.totalorder %s3270_s25, 3 }
  0x18   : > { %4016 = sst [smem:[#allocation10_spill]] %s4015_s28 }
  0x19   : > { %p663_p9 = pnand %p2707_p7, %p662_p8 }
  0x1a   : > { %p738_p10 = scmp.lt.s32.totalorder (!%p663_p9), %s3431_s5, 1  ;;  %s4017_s2 = sld [smem:[#allocation11_spill]] (!%p663_p9) }
  0x1b   : > { %666 = sbr.rel (%p663_p9) target bundleno = 4204 (0x106c), region = 108  ;;  %s4019_s1 = sld [smem:[#allocation14_spill]] (!%p663_p9) }
  0x1c   : > { %s4020_s27 = sld [smem:[#allocation15_spill]] (!%p663_p9)  ;;  %s3984_s0 = smov (!%p663_p9), 112  }
  0x1d   : > { %s4023_s4 = sld [smem:[#allocation12_spill]] (!%p663_p9)  ;;  %s4024_s28 = smov (!%p663_p9), 120  }
  0x1e   : > { %s4032_s26 = smov (!%p663_p9), 16  }
  0x20   : > { %s3460_s29 = scalar_select %p738_p10, %s3431_s5, 1  ;;  %vm760_vm0 = vcmask 261120   ;;  %v3272_v15 = vmov 0.0   ;;  %vm3273_vm1 = vmmov 0   ;;  %vm869_vm2 = vcmask 64512  }
  0x21   : > { %2840 = vmatprep.subr.bf16.mxu0 %v3272_v15  ;;  %2844 = vmatprep.mubr.msk.bf16.mxu0 %vm3273_vm1, %v3272_v15  ;;  %v2714_v25 = vld [vmem:[%s4019_s1] ss:$0 sm:$0xff]  ;;  %s3983_s1 = smov 80   ;;  %vm919_vm3 = vcmask 130048   ;;  %vm1387_vm4 = vcmask 195584   ;;  %vm1706_vm5 = vcmask 1043456  }
  0x22   : > { %s3978_s3 = sshll.u32 %s3460_s29, 4  ;;  %2860 = vmatprep.subr.bf16.mxu1 %v3272_v15  ;;  %2862 = vmatprep.mubr.msk.bf16.mxu1 %vm3273_vm1, %v3272_v15  ;;  %v2715_v29 = vld [vmem:[%s4020_s27] ss:$0 sm:$0xff]  ;;  %s3982_s27 = smov 96   ;;  %vm2272_vm6 = vcmask 0  }
  0x23   : > { %s742_s6 = scalar_lea.vmem %s4017_s2, %s3978_s3  ;;  %s4018_s2 = sld [smem:[#allocation16_spill]] }
  0x24   : > { %v3468_v0 = vld [vmem:[%s742_s6] sm:$0xff]  ;;  %v3472_v2 = vld [vmem:[%s742_s6 + $0x8] sm:$0xff]  ;;  %s3980_s3 = smov 88   ;;  %s3986_s6 = smov 104  }
  0x25   : > { %v761_v1 = vsel %vm760_vm0, %v3468_v0, 0.0  ;;  %v764_v3 = vsel %vm760_vm0, %v3472_v2, 0.0 }
  0x26   : > { %762 = vadd.xlane.f32.xlu0 %v761_v1 }
  0x29   : > { %v3100_v14 = vld [vmem:[%s4018_s2 + $0x8] sm:$0xff]   ;;  %v3101_v16 = vld [vmem:[%s4018_s2] sm:$0xff]   ;;  %s3988_s2 = smov 120  }
  0x2a   : > { %765 = vadd.xlane.f32.xlu0 %v764_v3  ;;  %2841 = vmatpush3.bf16.msra.mxu0 %v3100_v14 }
  0x2b   : > { %2842 = vmatprep.subr.bf16.mxu0 %v3272_v15 }
  0x2e   : > { %2843 = vmatpush3.bf16.msra.mxu0 %v3101_v16 }
  0x2f   : > { %2848 = vmatprep.subr.bf16.mxu0 %v3272_v15 }
  0xaf   : > { %v763_v4 = vpop.xlane.xlu0 %762 }
  0xb0   : > { %v768_v5 = vmul.f32 0.03125, %v763_v4 }
  0xb2   : > { %v770_v6 = vsub.f32 %v3468_v0, %v768_v5 }
  0xb3   : > { %v766_v7 = vpop.xlane.xlu0 %765 }
  0xb4   : > { %v769_v8 = vmul.f32 0.03125, %v766_v7  ;;  %v772_v9 = vmul.f32 %v770_v6, %v770_v6 }
  0xb6   : > { %v771_v10 = vsub.f32 %v3472_v2, %v769_v8  ;;  %v774_v11 = vsel %vm760_vm0, %v772_v9, 0.0 }
  0xb7   : > { %775 = vadd.xlane.f32.xlu1 %v774_v11 }
  0xb8   : > { %v773_v12 = vmul.f32 %v771_v10, %v771_v10 }
  0xba   : > { %v777_v13 = vsel %vm760_vm0, %v773_v12, 0.0 }
  0xbb   : > { %778 = vadd.xlane.f32.xlu1 %v777_v13 }
 0x140   : > { %v776_v17 = vpop.xlane.xlu1 %775 }
 0x141   : > { %v780_v18 = vmul.f32 0.03125, %v776_v17 }
 0x143   : > { %v782_v19 = vadd.f32 1e-05, %v780_v18 }
 0x144   : > { %v779_v20 = vpop.xlane.xlu1 %778 }
 0x145   : > { %3122 = vrsqrt.f32 %v782_v19  ;;  %v781_v21 = vmul.f32 0.03125, %v779_v20 }
 0x147   : > { %v783_v22 = vadd.f32 1e-05, %v781_v21 }
 0x149   : > { %3124 = vrsqrt.f32 %v783_v22 }
 0x152   : > { %v3123_v23 = vpop.eup %3122 }
 0x153   : > { %v786_v24 = vmul.f32 %v3123_v23, %v770_v6 }
 0x155   : > { %v794_v28 = vmul.f32 %v2714_v25, %v786_v24 }
 0x156   : > { %v3125_v26 = vpop.eup %3124 }
 0x157   : > { %v787_v27 = vmul.f32 %v3125_v26, %v771_v10  ;;  %v802_v31 = vadd.f32 %v2715_v29, %v794_v28 }
 0x159   : > { %v795_v30 = vmul.f32 %v2714_v25, %v787_v27 }
 0x15b   : > { %v803_v32 = vadd.f32 %v2715_v29, %v795_v30 }
 0x15d   : > { %v804_v33 = vpack.c.bf16 %v803_v32, %v802_v31 }
 0x15f   : > { %2845 = vmatmul.mubr.msk.bf16.vlgmr.msra.gmra.mxu0 %vm760_vm0, %v804_v33 }
 0x160   : > { %2850 = vmatprep.mubr.msk.bf16.mxu0 %vm3273_vm1, %v3272_v15 }
 0x21f   : > { %v858_v34 = vpop.f32.mrf.mxu0 }
 0x221   : > { %v2846_v35 = vpop.f32.mrf.mxu0 }
 0x223   : > { %v861_v36 = vpop.f32.mrf.mxu0 }
 0x224   : > { %v3503_v37 = vpack.c.bf16 %v861_v36, %v858_v34 }
 0x225   : > { %v2847_v38 = vpop.f32.mrf.mxu0 }
 0x226   : > { %992 = vrot.lane.b32.xlu1 %v3503_v37, %s3980_s3  ;;  %867 = vrot.lane.b32.xlu0 %v3503_v37, %s3982_s27  ;;  %s3981_s3 = smov 72   ;;  %s3283_s27 = smov 40  }
 0x22a   : > { %990 = vrot.lane.b32.xlu1 %v3503_v37, %s3988_s2  ;;  %1113 = vrot.lane.b32.xlu0 %v3503_v37, %s3984_s0  ;;  %s3992_s0 = smov 8   ;;  %s4030_s2 = smov 72  }
 0x22e   : > { %1115 = vrot.lane.b32.xlu1 %v3503_v37, %s3983_s1  ;;  %1236 = vrot.lane.b32.xlu0 %v3503_v37, %s3986_s6  ;;  %s3284_s1 = smov 56   ;;  %s4028_s6 = smov 80  }
 0x232   : > { %1238 = vrot.lane.b32.xlu1 %v3503_v37, %s3981_s3  ;;  %s3281_s3 = smov 64  }
 0x298   : > { %v993_v39 = vpop.permute.xlu1 %992  ;;  %v868_v40 = vpop.permute.xlu0 %867 }
 0x299   : > { %v874_v41 = vsel %vm869_vm2, %v868_v40, 0  ;;  %v998_v42 = vsel %vm869_vm2, %v993_v39, 0 }
 0x29a   : > { %2849 = vmatpush3.bf16.xpose.msra.mxu0 %v874_v41  ;;  %2861 = vmatpush3.bf16.xpose.msra.mxu1 %v998_v42 }
 0x29b   : > { %2872 = vmatprep.subr.bf16.mxu1 %v3272_v15  ;;  %2854 = vmatprep.subr.bf16.mxu0 %v3272_v15 }
 0x29c   : > { %v991_v43 = vpop.permute.xlu1 %990  ;;  %v1114_v47 = vpop.permute.xlu0 %1113 }
 0x2a0   : > { %v1116_v44 = vpop.permute.xlu1 %1115  ;;  %v1237_v49 = vpop.permute.xlu0 %1236 }
 0x2a1   : > { %v1121_v45 = vsel %vm869_vm2, %v1116_v44, 0  ;;  %2851 = vmatmul.mubr.msk.bf16.vlgmr.msra.gmra.mxu0 %vm869_vm2, %v3503_v37  ;;  %2863 = vmatmul.mubr.msk.bf16.vlgmr.msra.gmra.mxu1 %vm869_vm2, %v991_v43 }
 0x2a2   : > { %2873 = vmatpush3.bf16.xpose.msra.mxu1 %v1121_v45  ;;  %2874 = vmatprep.mubr.msk.bf16.mxu1 %vm3273_vm1, %v3272_v15 }
 0x2a3   : > { %2884 = vmatprep.subr.bf16.mxu1 %v3272_v15  ;;  %2856 = vmatprep.mubr.msk.bf16.mxu0 %vm3273_vm1, %v3272_v15 }
 0x2a4   : > { %v1239_v46 = vpop.permute.xlu1 %1238 }
 0x2a5   : > { %v1244_v48 = vsel %vm869_vm2, %v1239_v46, 0 }
 0x2a9   : > { %2875 = vmatmul.mubr.msk.bf16.vlgmr.msra.gmra.mxu1 %vm869_vm2, %v1114_v47 }
 0x2aa   : > { %2885 = vmatpush3.bf16.xpose.msra.mxu1 %v1244_v48  ;;  %2886 = vmatprep.mubr.msk.bf16.mxu1 %vm3273_vm1, %v3272_v15 }
 0x2ab   : > { %2896 = vmatprep.subr.bf16.mxu1 %v3272_v15 }
 0x2b1   : > { %2887 = vmatmul.mubr.msk.bf16.vlgmr.msra.gmra.mxu1 %vm869_vm2, %v1237_v49 }
 0x2b2   : > { %2900 = vmatprep.mubr.msk.bf16.mxu1 %vm3273_vm1, %v3272_v15 }
 0x361   : > { %v910_v50 = vpop.f32.mrf.mxu0  ;;  %v1034_v51 = vpop.f32.mrf.mxu1 }
 0x362   : > { %v917_v52 = vmul.f32 0.35355338, %v910_v50  ;;  %v1041_v61 = vmul.f32 0.35355338, %v1034_v51 }
 0x363   : > { %v2852_v53 = vpop.f32.mrf.mxu0  ;;  %v2864_v54 = vpop.f32.mrf.mxu1 }
 0x364   : > { %v920_v55 = vsel %vm919_vm3, %v917_v52, -inf  ;;  %v1043_v6 = vsel %vm919_vm3, %v1041_v61, -inf }
 0x365   : > { %v1037_v56 = vpop.f32.mrf.mxu1  ;;  %921 = vmax.xlane.f32.xlu1 %v920_v55  ;;  %v913_v57 = vpop.f32.mrf.mxu0 }
 0x366   : > { %v918_v58 = vmul.f32 0.35355338, %v913_v57  ;;  %v1042_v4 = vmul.f32 0.35355338, %v1037_v56 }
 0x367   : > { %v2853_v59 = vpop.f32.mrf.mxu0  ;;  %v2865_v60 = vpop.f32.mrf.mxu1 }
 0x368   : > { %v923_v62 = vsel %vm919_vm3, %v918_v58, -inf  ;;  %v1046_v10 = vsel %vm919_vm3, %v1042_v4, -inf }
 0x369   : > { %v1157_v63 = vpop.f32.mrf.mxu1  ;;  %924 = vmax.xlane.f32.xlu0 %v923_v62 }
 0x36a   : > { %v1164_v1 = vmul.f32 0.35355338, %v1157_v63 }
 0x36b   : > { %v2876_v3 = vpop.f32.mrf.mxu1 }
 0x36c   : > { %v1166_v5 = vsel %vm919_vm3, %v1164_v1, -inf }
 0x36d   : > { %v1160_v7 = vpop.f32.mrf.mxu1  ;;  %1167 = vmax.xlane.f32.xlu1 %v1166_v5  ;;  %1044 = vmax.xlane.f32.xlu0 %v1043_v6 }
 0x36e   : > { %v1165_v9 = vmul.f32 0.35355338, %v1160_v7 }
 0x36f   : > { %v2877_v8 = vpop.f32.mrf.mxu1 }
 0x370   : > { %v1169_v16 = vsel %vm919_vm3, %v1165_v9, -inf }
 0x371   : > { %v1280_v11 = vpop.f32.mrf.mxu1  ;;  %1047 = vmax.xlane.f32.xlu0 %v1046_v10 }
 0x372   : > { %v1287_v12 = vmul.f32 0.35355338, %v1280_v11 }
 0x373   : > { %v2888_v13 = vpop.f32.mrf.mxu1 }
 0x374   : > { %v1289_v14 = vsel %vm919_vm3, %v1287_v12, -inf }
 0x375   : > { %v1283_v17 = vpop.f32.mrf.mxu1  ;;  %1290 = vmax.xlane.f32.xlu1 %v1289_v14  ;;  %1170 = vmax.xlane.f32.xlu0 %v1169_v16 }
 0x376   : > { %v1288_v18 = vmul.f32 0.35355338, %v1283_v17 }
 0x377   : > { %v2889_v19 = vpop.f32.mrf.mxu1 }
 0x378   : > { %v1292_v20 = vsel %vm919_vm3, %v1288_v18, -inf }
 0x379   : > { %1293 = vmax.xlane.f32.xlu0 %v1292_v20 }
 0x386   : > { %943 = vrot.lane.b32.xlu1 %v3503_v37, %s3281_s3  ;;  %s3282_s3 = smov 48  }
 0x3ee   : > { %v922_v21 = vpop.xlane.xlu1 %921 }
 0x3ef   : > { %v926_v22 = vsub.f32 %v917_v52, %v922_v21 }
 0x3f1   : > { %v928_v23 = vmul.f32 1.442695, %v926_v22 }
 0x3f2   : > { %v925_v24 = vpop.xlane.xlu0 %924 }
 0x3f3   : > { %3126 = vpow2.f32 %v928_v23  ;;  %v927_v25 = vsub.f32 %v918_v58, %v925_v24 }
 0x3f5   : > { %v930_v26 = vmul.f32 1.442695, %v927_v25 }
 0x3f6   : > { %v1168_v27 = vpop.xlane.xlu1 %1167  ;;  %v1045_v28 = vpop.xlane.xlu0 %1044 }
 0x3f7   : > { %3128 = vpow2.f32 %v930_v26  ;;  %v1172_v29 = vsub.f32 %v1164_v1, %v1168_v27  ;;  %v1049_v30 = vsub.f32 %v1041_v61, %v1045_v28 }
 0x3f9   : > { %v1051_v31 = vmul.f32 1.442695, %v1049_v30  ;;  %v1174_v32 = vmul.f32 1.442695, %v1172_v29 }
 0x3fa   : > { %v1048_v33 = vpop.xlane.xlu0 %1047 }
 0x3fb   : > { %v1050_v34 = vsub.f32 %v1042_v4, %v1048_v33  ;;  %3130 = vpow2.f32 %v1051_v31 }
 0x3fc   : > { %3132 = vpow2.f32 %v1174_v32 }
 0x3fd   : > { %v1053_v35 = vmul.f32 1.442695, %v1050_v34 }
 0x3fe   : > { %v1291_v36 = vpop.xlane.xlu1 %1290  ;;  %v1171_v38 = vpop.xlane.xlu0 %1170 }
 0x3ff   : > { %3134 = vpow2.f32 %v1053_v35  ;;  %v1295_v39 = vsub.f32 %v1287_v12, %v1291_v36  ;;  %v1173_v40 = vsub.f32 %v1165_v9, %v1171_v38 }
 0x400   : > { %v3127_v41 = vpop.eup %3126 }
 0x401   : > { %v1297_v42 = vmul.f32 1.442695, %v1295_v39  ;;  %v1176_v43 = vmul.f32 1.442695, %v1173_v40  ;;  %v932_v44 = vsel %vm919_vm3, %v3127_v41, 0.0 }
 0x402   : > { %933 = vadd.xlane.f32.xlu1 %v932_v44  ;;  %v944_v45 = vpop.permute.xlu1 %943  ;;  %v1294_v46 = vpop.xlane.xlu0 %1293 }
 0x403   : > { %3136 = vpow2.f32 %v1297_v42  ;;  %v1296_v47 = vsub.f32 %v1288_v18, %v1294_v46  ;;  %2855 = vmatpush3.bf16.msra.mxu0 %v944_v45 }
 0x404   : > { %v3129_v48 = vpop.eup %3128  ;;  %3138 = vpow2.f32 %v1176_v43  ;;  %2866 = vmatprep.subr.bf16.mxu0 %v3272_v15 }
 0x405   : > { %v1299_v49 = vmul.f32 1.442695, %v1296_v47  ;;  %v935_v50 = vsel %vm919_vm3, %v3129_v48, 0.0 }
 0x406   : > { %936 = vadd.xlane.f32.xlu0 %v935_v50 }
 0x407   : > { %3140 = vpow2.f32 %v1299_v49 }
 0x408   : > { %v3131_v51 = vpop.eup %3130 }
 0x409   : > { %v1055_v52 = vsel %vm919_vm3, %v3131_v51, 0.0  ;;  %v3133_v53 = vpop.eup %3132 }
 0x40a   : > { %1056 = vadd.xlane.f32.xlu1 %v1055_v52  ;;  %v1178_v56 = vsel %vm919_vm3, %v3133_v53, 0.0 }
 0x40c   : > { %v3135_v54 = vpop.eup %3134 }
 0x40d   : > { %v1058_v55 = vsel %vm919_vm3, %v3135_v54, 0.0 }
 0x40e   : > { %1059 = vadd.xlane.f32.xlu0 %v1058_v55  ;;  %1179 = vadd.xlane.f32.xlu1 %v1178_v56 }
 0x410   : > { %v3555_v57 = vpop.eup %3136 }
 0x411   : > { %v3139_v58 = vpop.eup %3138  ;;  %v1301_v59 = vsel %vm919_vm3, %v3555_v57, 0.0 }
 0x412   : > { %v1181_v60 = vsel %vm919_vm3, %v3139_v58, 0.0  ;;  %1302 = vadd.xlane.f32.xlu1 %v1301_v59 }
 0x413   : > { %1182 = vadd.xlane.f32.xlu0 %v1181_v60 }
 0x414   : > { %v3141_v61 = vpop.eup %3140 }
 0x415   : > { %v1304_v62 = vsel %vm919_vm3, %v3141_v61, 0.0 }
 0x417   : > { %1305 = vadd.xlane.f32.xlu0 %v1304_v62 }
 0x423   : > { %1189 = vrot.lane.b32.xlu1 %v3503_v37, %s3282_s3  ;;  %s4021_s3 = sld [smem:[#allocation17_spill]] }
 0x427   : > { %1312 = vrot.lane.b32.xlu1 %v3503_v37, %s3283_s27  ;;  %s3991_s27 = smov 16  }
 0x429   : > { %v3102_v40 = vld [vmem:[%s4021_s3 + $0x8] sm:$0xff]   ;;  %v3103_v46 = vld [vmem:[%s4021_s3] sm:$0xff]   ;;  %s4026_s3 = smov 112  }
 0x42a   : > { %2897 = vmatpush3.bf16.msra.mxu1 %v3102_v40 }
 0x42b   : > { %2898 = vmatprep.subr.bf16.mxu1 %v3272_v15 }
 0x42d   : > { %1066 = vrot.lane.b32.xlu0 %v3503_v37, %s3284_s1  ;;  %s3990_s1 = smov 24  }
 0x42e   : > { %2899 = vmatpush3.bf16.msra.mxu1 %v3103_v46  ;;  %v2732_v46 = vld [vmem:[%s3961_s9] ss:$0 sm:$0xff] }
 0x42f   : > { %2912 = vmatprep.subr.bf16.mxu1 %v3272_v15 }
 0x48b   : > { %v934_v63 = vpop.xlane.xlu1 %933 }
 0x48c   : > { %3142 = vrcp.f32 %v934_v63 }
 0x48f   : > { %v937_v1 = vpop.xlane.xlu0 %936 }
 0x490   : > { %3144 = vrcp.f32 %v937_v1 }
 0x493   : > { %v1057_v3 = vpop.xlane.xlu1 %1056 }
 0x494   : > { %3146 = vrcp.f32 %v1057_v3 }
 0x497   : > { %v1060_v4 = vpop.xlane.xlu0 %1059  ;;  %v1180_v5 = vpop.xlane.xlu1 %1179 }
 0x498   : > { %3148 = vrcp.f32 %v1060_v4 }
 0x499   : > { %v3143_v6 = vpop.eup %3142  ;;  %3150 = vrcp.f32 %v1180_v5 }
 0x49a   : > { %v940_v9 = vmul.f32 %v3143_v6, %v3127_v41 }
 0x49b   : > { %v1303_v13 = vpop.xlane.xlu1 %1302 }
 0x49c   : > { %v1183_v7 = vpop.xlane.xlu0 %1182 }
 0x49d   : > { %v3145_v8 = vpop.eup %3144  ;;  %3152 = vrcp.f32 %v1183_v7 }
 0x49e   : > { %v941_v10 = vmul.f32 %v3145_v8, %v3129_v48 }
 0x49f   : > { %v1190_v21 = vpop.permute.xlu1 %1189 }
 0x4a0   : > { %v1306_v11 = vpop.xlane.xlu0 %1305  ;;  %v942_v12 = vpack.c.bf16 %v941_v10, %v940_v9 }
 0x4a1   : > { %v3147_v37 = vpop.eup %3146  ;;  %3154 = vrcp.f32 %v1306_v11 }
 0x4a2   : > { %2857 = vmatmul.mubr.msk.bf16.vlgmr.msra.gmra.mxu0 %vm919_vm3, %v942_v12  ;;  %3156 = vrcp.f32 %v1303_v13  ;;  %v1063_v17 = vmul.f32 %v3147_v37, %v3131_v51 }
 0x4a3   : > { %2868 = vmatprep.mubr.msk.bf16.mxu0 %vm3273_vm1, %v3272_v15  ;;  %v1313_v27 = vpop.permute.xlu1 %1312 }
 0x4a4   : > { %v1067_v14 = vpop.permute.xlu0 %1066 }
 0x4a5   : > { %v3149_v16 = vpop.eup %3148  ;;  %2867 = vmatpush3.bf16.msra.mxu0 %v1067_v14 }
 0x4a6   : > { %2878 = vmatprep.subr.bf16.mxu0 %v3272_v15  ;;  %v1064_v18 = vmul.f32 %v3149_v16, %v3135_v54  ;;  %v3151_v20 = vpop.eup %3150 }
 0x4a7   : > { %v1186_v24 = vmul.f32 %v3151_v20, %v3133_v53 }
 0x4a8   : > { %v1065_v19 = vpack.c.bf16 %v1064_v18, %v1063_v17 }
 0x4aa   : > { %2869 = vmatmul.mubr.msk.bf16.vlgmr.msra.gmra.mxu0 %vm919_vm3, %v1065_v19  ;;  %v3153_v22 = vpop.eup %3152 }
 0x4ab   : > { %2879 = vmatpush3.bf16.msra.mxu0 %v1190_v21  ;;  %2880 = vmatprep.mubr.msk.bf16.mxu0 %vm3273_vm1, %v3272_v15  ;;  %v1187_v23 = vmul.f32 %v3153_v22, %v3139_v58 }
 0x4ac   : > { %2890 = vmatprep.subr.bf16.mxu0 %v3272_v15 }
 0x4ad   : > { %v1188_v25 = vpack.c.bf16 %v1187_v23, %v1186_v24 }
 0x4ae   : > { %v3155_v26 = vpop.eup %3154 }
 0x4af   : > { %v3157_v28 = vpop.eup %3156  ;;  %v1310_v29 = vmul.f32 %v3155_v26, %v3141_v61 }
 0x4b0   : > { %v1309_v30 = vmul.f32 %v3157_v28, %v3555_v57  ;;  %v3105_v28 = vld [vmem:[%s3963_s11] sm:$0xff]  }
 0x4b2   : > { %2881 = vmatmul.mubr.msk.bf16.vlgmr.msra.gmra.mxu0 %vm919_vm3, %v1188_v25  ;;  %v1311_v31 = vpack.c.bf16 %v1310_v29, %v1309_v30  ;;  %v3106_v29 = vld [vmem:[%s3962_s10 + $0x8] sm:$0xff]  }
 0x4b3   : > { %2891 = vmatpush3.bf16.msra.mxu0 %v1313_v27  ;;  %2892 = vmatprep.mubr.msk.bf16.mxu0 %vm3273_vm1, %v3272_v15  ;;  %v3104_v27 = vld [vmem:[%s3963_s11 + $0x8] sm:$0xff]  }
 0x4b4   : > { %2904 = vmatprep.subr.bf16.mxu0 %v3272_v15 }
 0x4ba   : > { %2893 = vmatmul.mubr.msk.bf16.vlgmr.msra.gmra.mxu0 %vm919_vm3, %v1311_v31 }
 0x4bb   : > { %2908 = vmatprep.mubr.msk.bf16.mxu0 %vm3273_vm1, %v3272_v15  ;;  %2905 = vmatpush3.bf16.msra.mxu0 %v3106_v29 }
 0x4bc   : > { %2906 = vmatprep.subr.bf16.mxu0 %v3272_v15 }
 0x562   : > { %v983_v32 = vpop.f32.mrf.mxu0 }
 0x564   : > { %v2858_v33 = vpop.f32.mrf.mxu0 }
 0x566   : > { %v986_v34 = vpop.f32.mrf.mxu0 }
 0x568   : > { %v2859_v35 = vpop.f32.mrf.mxu0 }
 0x56a   : > { %v1106_v36 = vpop.f32.mrf.mxu0 }
 0x56c   : > { %v2870_v38 = vpop.f32.mrf.mxu0 }
 0x56e   : > { %v1109_v39 = vpop.f32.mrf.mxu0 }
 0x56f   : > { %v3070_v41 = vpack.i.bf16 %v1109_v39, %v1106_v36 }
 0x570   : > { %v2871_v42 = vpop.f32.mrf.mxu0 }
 0x571   : > { %3071 = vrot.lane.b32.xlu1 %v3070_v41, %s3992_s0  ;;  %s2711_s0 = sshll.u32 %s3460_s29, 3  ;;  %v2731_v42 = vld [vmem:[%s3960_s8] ss:$0 sm:$0xff] }
 0x572   : > { %v1229_v43 = vpop.f32.mrf.mxu0  ;;  %s746_s25 = scalar_lea.vmem %s4023_s4, %s2711_s0  ;;  %s4025_s0 = smov 104  }
 0x573   : > { %v1460_v30 = vld [vmem:[%s746_s25] sm:$0xff]  ;;  %s4031_s25 = smov 8  }
 0x574   : > { %v2882_v44 = vpop.f32.mrf.mxu0  ;;  %v1566_v31 = vpack.c.bf16 %v1460_v30, %v1460_v30 }
 0x576   : > { %v1232_v45 = vpop.f32.mrf.mxu0 }
 0x577   : > { %v3075_v47 = vpack.i.bf16 %v1232_v45, %v1229_v43 }
 0x578   : > { %v2883_v48 = vpop.f32.mrf.mxu0 }
 0x579   : > { %3076 = vrot.lane.b32.xlu0 %v3075_v47, %s3991_s27  ;;  %s4027_s27 = smov 88  }
 0x57a   : > { %v1352_v49 = vpop.f32.mrf.mxu0 }
 0x57c   : > { %v2894_v50 = vpop.f32.mrf.mxu0 }
 0x57e   : > { %v1355_v51 = vpop.f32.mrf.mxu0 }
 0x57f   : > { %v3080_v52 = vpack.i.bf16 %v1355_v51, %v1352_v49 }
 0x580   : > { %v2895_v53 = vpop.f32.mrf.mxu0 }
 0x581   : > { %3081 = vrot.lane.b32.xlu1 %v3080_v52, %s3990_s1  ;;  %s4022_s1 = sld [smem:[#allocation18_spill]] }
 0x587   : > { %v2727_v8 = vld [vmem:[%s4022_s1] ss:$0 sm:$0xff]  ;;  %s4029_s1 = smov 96  }
 0x5e3   : > { %v3072_v54 = vpop.permute.xlu1 %3071 }
 0x5e4   : > { %v3074_v56 = vunpack.i.h.bf16 %v3072_v54  ;;  %v3073_v57 = vunpack.i.l.bf16 %v3072_v54 }
 0x5e6   : > { %v1384_v61 = vsel %vm869_vm2, %v986_v34, %v3074_v56  ;;  %v1383_v62 = vsel %vm869_vm2, %v983_v32, %v3073_v57  ;;  %v3107_v32 = vld [vmem:[%s3962_s10] sm:$0xff]  }
 0x5e7   : > { %2907 = vmatpush3.bf16.msra.mxu0 %v3107_v32 }
 0x5e8   : > { %2920 = vmatprep.subr.bf16.mxu0 %v3272_v15 }
 0x5eb   : > { %v3077_v55 = vpop.permute.xlu0 %3076 }
 0x5ec   : > { %v3079_v58 = vunpack.i.h.bf16 %v3077_v55  ;;  %v3078_v59 = vunpack.i.l.bf16 %v3077_v55 }
 0x5ee   : > { %v1386_v3 = vsel %vm919_vm3, %v1384_v61, %v3079_v58  ;;  %v1385_v4 = vsel %vm919_vm3, %v1383_v62, %v3078_v59 }
 0x5f3   : > { %v3082_v60 = vpop.permute.xlu1 %3081 }
 0x5f4   : > { %v3084_v63 = vunpack.i.h.bf16 %v3082_v60  ;;  %v3083_v1 = vunpack.i.l.bf16 %v3082_v60 }
 0x5f6   : > { %v1389_v5 = vsel %vm1387_vm4, %v1386_v3, %v3084_v63  ;;  %v1388_v6 = vsel %vm1387_vm4, %v1385_v4, %v3083_v1 }
 0x5f7   : > { %v1390_v7 = vpack.c.bf16 %v1389_v5, %v1388_v6 }
 0x5f9   : > { %2901 = vmatmul.mubr.msk.bf16.vlgmr.msra.gmra.mxu1 %vm760_vm0, %v1390_v7 }
 0x5fa   : > { %2916 = vmatprep.mubr.msk.bf16.mxu1 %vm3273_vm1, %v3272_v15  ;;  %2913 = vmatpush3.bf16.msra.mxu1 %v3104_v27 }
 0x5fb   : > { %2914 = vmatprep.subr.bf16.mxu1 %v3272_v15 }
 0x5fe   : > { %2915 = vmatpush3.bf16.msra.mxu1 %v3105_v28 }
 0x5ff   : > { %2926 = vmatprep.subr.bf16.mxu1 %v3272_v15 }
 0x601   : > { %2917 = vmatmul.mubr.msk.bf16.vlgmr.msra.gmra.mxu1 %vm760_vm0, %v1566_v31 }
 0x602   : > { %2928 = vmatprep.mubr.msk.bf16.mxu1 %vm3273_vm1, %v3272_v15 }
 0x6b9   : > { %v1451_v9 = vpop.f32.mrf.mxu1 }
 0x6ba   : > { %v1452_v10 = vadd.f32 %v2727_v8, %v1451_v9 }
 0x6bb   : > { %v2902_v11 = vpop.f32.mrf.mxu1 }
 0x6bc   : > { %v3604_v12 = vadd.f32 %v1452_v10, %v3468_v0 }
 0x6bd   : > { %v1454_v37 = vpop.f32.mrf.mxu1 }
 0x6be   : > { %v1455_v13 = vadd.f32 %v2727_v8, %v1454_v37  ;;  %v1463_v14 = vsel %vm760_vm0, %v3604_v12, 0.0 }
 0x6bf   : > { %1464 = vadd.xlane.f32.xlu0 %v1463_v14  ;;  %v2903_v16 = vpop.f32.mrf.mxu1 }
 0x6c0   : > { %v3609_v17 = vadd.f32 %v1455_v13, %v3472_v2 }
 0x6c1   : > { %v1620_v51 = vpop.f32.mrf.mxu1 }
 0x6c2   : > { %v1466_v18 = vsel %vm760_vm0, %v3609_v17, 0.0  ;;  %v3649_v52 = vpack.c.bf16 %v1620_v51, %v1620_v51 }
 0x6c3   : > { %1467 = vadd.xlane.f32.xlu1 %v1466_v18  ;;  %v2918_v53 = vpop.f32.mrf.mxu1 }
 0x6c4   : > { %v1632_v55 = vsel %vm869_vm2, %v3649_v52, 0 }
 0x6c5   : > { %v1623_v54 = vpop.f32.mrf.mxu1 }
 0x6c7   : > { %v2919_v56 = vpop.f32.mrf.mxu1 }
 0x748   : > { %v1465_v19 = vpop.xlane.xlu0 %1464 }
 0x749   : > { %v1469_v20 = vmul.f32 0.03125, %v1465_v19 }
 0x74b   : > { %v1471_v0 = vsub.f32 %v3604_v12, %v1469_v20 }
 0x74c   : > { %v1468_v21 = vpop.xlane.xlu1 %1467 }
 0x74d   : > { %v1470_v22 = vmul.f32 0.03125, %v1468_v21  ;;  %v1473_v23 = vmul.f32 %v1471_v0, %v1471_v0 }
 0x74f   : > { %v1472_v24 = vsub.f32 %v3609_v17, %v1470_v22  ;;  %v1475_v25 = vsel %vm760_vm0, %v1473_v23, 0.0 }
 0x750   : > { %1476 = vadd.xlane.f32.xlu0 %v1475_v25 }
 0x751   : > { %v1474_v26 = vmul.f32 %v1472_v24, %v1472_v24 }
 0x753   : > { %v1478_v2 = vsel %vm760_vm0, %v1474_v26, 0.0 }
 0x754   : > { %1479 = vadd.xlane.f32.xlu0 %v1478_v2 }
 0x76a   : > { %1754 = vrot.lane.b32.xlu0 %v3649_v52, %s4024_s28 }
 0x76e   : > { %2008 = vrot.lane.b32.xlu0 %v3649_v52, %s4025_s0 }
 0x7d9   : > { %v1477_v33 = vpop.xlane.xlu0 %1476 }
 0x7da   : > { %v1481_v34 = vmul.f32 0.03125, %v1477_v33 }
 0x7dc   : > { %v1483_v35 = vadd.f32 1e-05, %v1481_v34 }
 0x7dd   : > { %v1480_v36 = vpop.xlane.xlu0 %1479 }
 0x7de   : > { %3158 = vrsqrt.f32 %v1483_v35  ;;  %v1482_v38 = vmul.f32 0.03125, %v1480_v36 }
 0x7e0   : > { %v1484_v39 = vadd.f32 1e-05, %v1482_v38 }
 0x7e1   : > { %v1755_v59 = vpop.permute.xlu0 %1754 }
 0x7e2   : > { %3160 = vrsqrt.f32 %v1484_v39  ;;  %v1760_v62 = vsel %vm869_vm2, %v1755_v59, 0 }
 0x7e5   : > { %v2009_v5 = vpop.permute.xlu0 %2008 }
 0x7e6   : > { %v2014_v7 = vsel %vm869_vm2, %v2009_v5, 0 }
 0x7eb   : > { %v3159_v40 = vpop.eup %3158 }
 0x7ec   : > { %v1487_v41 = vmul.f32 %v3159_v40, %v1471_v0 }
 0x7ee   : > { %v1495_v45 = vmul.f32 %v2731_v42, %v1487_v41 }
 0x7ef   : > { %v3161_v43 = vpop.eup %3160 }
 0x7f0   : > { %v1488_v44 = vmul.f32 %v3161_v43, %v1472_v24  ;;  %v1503_v48 = vadd.f32 %v2732_v46, %v1495_v45 }
 0x7f2   : > { %v1496_v47 = vmul.f32 %v2731_v42, %v1488_v44 }
 0x7f4   : > { %v1504_v49 = vadd.f32 %v2732_v46, %v1496_v47 }
 0x7f6   : > { %v1505_v50 = vpack.c.bf16 %v1504_v49, %v1503_v48 }
 0x7f8   : > { %2909 = vmatmul.mubr.msk.bf16.vlgmr.msra.gmra.mxu0 %vm760_vm0, %v1505_v50 }
 0x7f9   : > { %2922 = vmatprep.mubr.msk.bf16.mxu0 %vm3273_vm1, %v3272_v15  ;;  %2921 = vmatpush3.bf16.xpose.msra.mxu0 %v1632_v55 }
 0x7fa   : > { %2932 = vmatprep.subr.bf16.mxu0 %v3272_v15 }
 0x8b8   : > { %v1559_v57 = vpop.f32.mrf.mxu0 }
 0x8ba   : > { %v2910_v58 = vpop.f32.mrf.mxu0 }
 0x8bc   : > { %v1562_v60 = vpop.f32.mrf.mxu0 }
 0x8bd   : > { %v1626_v61 = vpack.c.bf16 %v1562_v60, %v1559_v57 }
 0x8be   : > { %v2911_v63 = vpop.f32.mrf.mxu0 }
 0x8bf   : > { %1752 = vrot.lane.b32.xlu1 %v1626_v61, %s4024_s28  ;;  %2923 = vmatmul.mubr.msk.bf16.vlgmr.msra.gmra.mxu0 %vm869_vm2, %v1626_v61  ;;  %s754_s28 = scalar_lea.vmem %s3975_s23, %s3460_s29 }
 0x8c0   : > { %2933 = vmatpush3.bf16.xpose.msra.mxu0 %v1760_v62  ;;  %2934 = vmatprep.mubr.msk.bf16.mxu0 %vm3273_vm1, %v3272_v15 }
 0x8c1   : > { %2944 = vmatprep.subr.bf16.mxu0 %v3272_v15 }
 0x8c3   : > { %1881 = vrot.lane.b32.xlu1 %v3649_v52, %s4026_s3 }
 0x8c7   : > { %1879 = vrot.lane.b32.xlu1 %v1626_v61, %s4026_s3  ;;  %s4033_s3 = smov 24  }
 0x8cb   : > { %2006 = vrot.lane.b32.xlu1 %v1626_v61, %s4025_s0 }
 0x931   : > { %v1753_v1 = vpop.permute.xlu1 %1752 }
 0x932   : > { %2935 = vmatmul.mubr.msk.bf16.vlgmr.msra.gmra.mxu0 %vm869_vm2, %v1753_v1 }
 0x933   : > { %2946 = vmatprep.mubr.msk.bf16.mxu0 %vm3273_vm1, %v3272_v15 }
 0x935   : > { %v1882_v3 = vpop.permute.xlu1 %1881 }
 0x936   : > { %v1887_v4 = vsel %vm869_vm2, %v1882_v3, 0 }
 0x937   : > { %2945 = vmatpush3.bf16.xpose.msra.mxu0 %v1887_v4 }
 0x938   : > { %2956 = vmatprep.subr.bf16.mxu0 %v3272_v15 }
 0x939   : > { %v1880_v6 = vpop.permute.xlu1 %1879 }
 0x93d   : > { %v2007_v8 = vpop.permute.xlu1 %2006 }
 0x93e   : > { %2947 = vmatmul.mubr.msk.bf16.vlgmr.msra.gmra.mxu0 %vm869_vm2, %v1880_v6 }
 0x93f   : > { %2957 = vmatpush3.bf16.xpose.msra.mxu0 %v2014_v7  ;;  %2958 = vmatprep.mubr.msk.bf16.mxu0 %vm3273_vm1, %v3272_v15 }
 0x940   : > { %2968 = vmatprep.subr.bf16.mxu0 %v3272_v15 }
 0x946   : > { %2959 = vmatmul.mubr.msk.bf16.vlgmr.msra.gmra.mxu0 %vm869_vm2, %v2007_v8 }
 0x947   : > { %2972 = vmatprep.mubr.msk.bf16.mxu0 %vm3273_vm1, %v3272_v15 }
 0x97f   : > { %v1668_v9 = vpop.f32.mrf.mxu0 }
 0x980   : > { %v3681_v10 = vmul.f32 0.35355338, %v1668_v9 }
 0x981   : > { %v2924_v11 = vpop.f32.mrf.mxu0 }
 0x982   : > { %v1677_v37 = vsel %vm869_vm2, %v3681_v10, -inf }
 0x983   : > { %1678 = vmax.xlane.f32.xlu0 %v1677_v37  ;;  %v1671_v13 = vpop.f32.mrf.mxu0 }
 0x984   : > { %v3685_v14 = vmul.f32 0.35355338, %v1671_v13 }
 0x985   : > { %v2925_v16 = vpop.f32.mrf.mxu0 }
 0x986   : > { %v1680_v18 = vsel %vm869_vm2, %v3685_v14, -inf }
 0x987   : > { %1681 = vmax.xlane.f32.xlu1 %v1680_v18 }
 0x9f2   : > { %v1796_v19 = vpop.f32.mrf.mxu0 }
 0x9f3   : > { %v3689_v20 = vmul.f32 0.35355338, %v1796_v19 }
 0x9f4   : > { %v2936_v0 = vpop.f32.mrf.mxu0 }
 0x9f5   : > { %v1807_v21 = vsel %vm869_vm2, %v3689_v20, -inf }
 0x9f6   : > { %1808 = vmax.xlane.f32.xlu0 %v1807_v21  ;;  %v1799_v22 = vpop.f32.mrf.mxu0 }
 0x9f7   : > { %v3693_v23 = vmul.f32 0.35355338, %v1799_v22 }
 0x9f8   : > { %v2937_v24 = vpop.f32.mrf.mxu0 }
 0x9f9   : > { %v1810_v25 = vsel %vm869_vm2, %v3693_v23, -inf }
 0x9fa   : > { %1811 = vmax.xlane.f32.xlu0 %v1810_v25 }
 0x9fe   : > { %v1923_v26 = vpop.f32.mrf.mxu0 }
 0x9ff   : > { %v3697_v2 = vmul.f32 0.35355338, %v1923_v26 }
 0xa00   : > { %v2948_v27 = vpop.f32.mrf.mxu0 }
 0xa01   : > { %v1934_v28 = vsel %vm869_vm2, %v3697_v2, -inf }
 0xa02   : > { %1935 = vmax.xlane.f32.xlu0 %v1934_v28  ;;  %v1926_v29 = vpop.f32.mrf.mxu0 }
 0xa03   : > { %v3701_v30 = vmul.f32 0.35355338, %v1926_v29 }
 0xa04   : > { %v2949_v31 = vpop.f32.mrf.mxu0 }
 0xa05   : > { %v1937_v32 = vsel %vm869_vm2, %v3701_v30, -inf }
 0xa06   : > { %1938 = vmax.xlane.f32.xlu1 %v1937_v32  ;;  %v2050_v33 = vpop.f32.mrf.mxu0 }
 0xa07   : > { %v3705_v34 = vmul.f32 0.35355338, %v2050_v33 }
 0xa08   : > { %v2960_v35 = vpop.f32.mrf.mxu0 }
 0xa09   : > { %v2061_v36 = vsel %vm869_vm2, %v3705_v34, -inf }
 0xa0a   : > { %2062 = vmax.xlane.f32.xlu0 %v2061_v36  ;;  %v2053_v38 = vpop.f32.mrf.mxu0 }
 0xa0b   : > { %v3709_v39 = vmul.f32 0.35355338, %v2053_v38 }
 0xa0c   : > { %v1679_v40 = vpop.xlane.xlu0 %1678  ;;  %v2961_v41 = vpop.f32.mrf.mxu0 }
 0xa0d   : > { %v1683_v42 = vsub.f32 %v3681_v10, %v1679_v40  ;;  %v2064_v43 = vsel %vm869_vm2, %v3709_v39, -inf }
 0xa0e   : > { %2065 = vmax.xlane.f32.xlu1 %v2064_v43 }
 0xa0f   : > { %v1685_v44 = vmul.f32 1.442695, %v1683_v42 }
 0xa10   : > { %v1682_v45 = vpop.xlane.xlu1 %1681 }
 0xa11   : > { %3162 = vpow2.f32 %v1685_v44  ;;  %v1684_v46 = vsub.f32 %v3685_v14, %v1682_v45 }
 0xa13   : > { %v1687_v47 = vmul.f32 1.442695, %v1684_v46 }
 0xa15   : > { %3164 = vpow2.f32 %v1687_v47 }
 0xa1e   : > { %v3715_v48 = vpop.eup %3162 }
 0xa1f   : > { %v1689_v49 = vsel %vm869_vm2, %v3715_v48, 0.0 }
 0xa20   : > { %1690 = vadd.xlane.f32.xlu0 %v1689_v49 }
 0xa22   : > { %v3719_v50 = vpop.eup %3164 }
 0xa23   : > { %v1692_v51 = vsel %vm869_vm2, %v3719_v50, 0.0 }
 0xa24   : > { %1693 = vadd.xlane.f32.xlu1 %v1692_v51 }
 0xa7f   : > { %v1809_v53 = vpop.xlane.xlu0 %1808 }
 0xa80   : > { %v1813_v54 = vsub.f32 %v3689_v20, %v1809_v53 }
 0xa82   : > { %v1815_v55 = vmul.f32 1.442695, %v1813_v54 }
 0xa83   : > { %v1812_v56 = vpop.xlane.xlu0 %1811 }
 0xa84   : > { %3166 = vpow2.f32 %v1815_v55  ;;  %v1814_v57 = vsub.f32 %v3693_v23, %v1812_v56 }
 0xa86   : > { %v1817_v58 = vmul.f32 1.442695, %v1814_v57 }
 0xa88   : > { %3168 = vpow2.f32 %v1817_v58 }
 0xa8b   : > { %v1936_v59 = vpop.xlane.xlu0 %1935 }
 0xa8c   : > { %v1940_v60 = vsub.f32 %v3697_v2, %v1936_v59 }
 0xa8e   : > { %v1942_v61 = vmul.f32 1.442695, %v1940_v60 }
 0xa8f   : > { %v1939_v62 = vpop.xlane.xlu1 %1938 }
 0xa90   : > { %3170 = vpow2.f32 %v1942_v61  ;;  %v1941_v63 = vsub.f32 %v3701_v30, %v1939_v62 }
 0xa91   : > { %v3727_v1 = vpop.eup %3166 }
 0xa92   : > { %v1944_v3 = vmul.f32 1.442695, %v1941_v63  ;;  %v1819_v4 = vsel %vm869_vm2, %v3727_v1, 0.0 }
 0xa93   : > { %1820 = vadd.xlane.f32.xlu0 %v1819_v4  ;;  %v2063_v5 = vpop.xlane.xlu0 %2062 }
 0xa94   : > { %3172 = vpow2.f32 %v1944_v3  ;;  %v2067_v6 = vsub.f32 %v3705_v34, %v2063_v5 }
 0xa95   : > { %v3169_v7 = vpop.eup %3168 }
 0xa96   : > { %v2069_v8 = vmul.f32 1.442695, %v2067_v6  ;;  %v1822_v9 = vsel %vm869_vm2, %v3169_v7, 0.0 }
 0xa97   : > { %1823 = vadd.xlane.f32.xlu1 %v1822_v9  ;;  %v2066_v0 = vpop.xlane.xlu1 %2065 }
 0xa98   : > { %3174 = vpow2.f32 %v2069_v8  ;;  %v2068_v21 = vsub.f32 %v3709_v39, %v2066_v0 }
 0xa9a   : > { %v2071_v22 = vmul.f32 1.442695, %v2068_v21 }
 0xa9c   : > { %3176 = vpow2.f32 %v2071_v22 }
 0xa9d   : > { %v3733_v11 = vpop.eup %3170 }
 0xa9e   : > { %v1946_v37 = vsel %vm869_vm2, %v3733_v11, 0.0 }
 0xa9f   : > { %1947 = vadd.xlane.f32.xlu0 %v1946_v37  ;;  %v3108_v37 = vld [vmem:[%s3964_s12 + $0x8] sm:$0xff]  }
 0xaa0   : > { %2969 = vmatpush3.bf16.msra.mxu0 %v3108_v37 }
 0xaa1   : > { %v3173_v13 = vpop.eup %3172  ;;  %2970 = vmatprep.subr.bf16.mxu0 %v3272_v15 }
 0xaa2   : > { %v1949_v16 = vsel %vm869_vm2, %v3173_v13, 0.0 }
 0xaa3   : > { %1950 = vadd.xlane.f32.xlu1 %v1949_v16 }
 0xaa5   : > { %v3738_v18 = vpop.eup %3174 }
 0xaa6   : > { %v2073_v19 = vsel %vm869_vm2, %v3738_v18, 0.0 }
 0xaa7   : > { %2074 = vadd.xlane.f32.xlu0 %v2073_v19 }
 0xaa9   : > { %v3177_v24 = vpop.eup %3176  ;;  %v1691_v27 = vpop.xlane.xlu0 %1690 }
 0xaaa   : > { %v2076_v25 = vsel %vm869_vm2, %v3177_v24, 0.0 }
 0xaad   : > { %v1694_v26 = vpop.xlane.xlu1 %1693 }
 0xaae   : > { %3178 = vrcp.f32 %v1694_v26 }
 0xaaf   : > { %3180 = vrcp.f32 %v1691_v27 }
 0xab4   : > { %1830 = vrot.lane.b32.xlu1 %v3649_v52, %s4027_s27  ;;  %s4034_s27 = sshll.u32 %s3460_s29, 4  ;;  %s730_s29 = sand.u32 1, %s3262_s30  }
 0xab8   : > { %1957 = vrot.lane.b32.xlu1 %v3649_v52, %s4028_s6  ;;  %s3288_s6 = smov [#allocation2]  }
 0xabb   : > { %v3179_v32 = vpop.eup %3178 }
 0xabc   : > { %v3181_v36 = vpop.eup %3180  ;;  %v1698_v38 = vmul.f32 %v3179_v32, %v3719_v50 }
 0xabd   : > { %1701 = vrot.lane.b32.xlu0 %v3649_v52, %s4029_s1  ;;  %v1697_v41 = vmul.f32 %v3181_v36, %v3715_v48  ;;  %s3214_s1 = sshll.u32 %s3288_s6, 4  ;;  %s3215_s1 = int_to_ptr.vmem [resolvable:$false] %s3214_s1 }
 0xabf   : > { %v1699_v43 = vpack.c.bf16 %v1698_v38, %v1697_v41 }
 0xadc   : > { %2077 = vadd.xlane.f32.xlu1 %v2076_v25 }
 0xaed   : > { %2084 = vrot.lane.b32.xlu1 %v3649_v52, %s4030_s2  ;;  %s4035_s2 = sld [smem:[#allocation13_spill]] }
 0xaf3   : > { %s751_s4 = scalar_lea.vmem %s4035_s2, %s4034_s27  ;;  %s2708_s2 = sshll.u32 %s730_s29, 4 }
 0xaf4   : > { %s3911_s27 = scalar_lea.sflag [#allocation3], %s730_s29 }
 0xb1c   : > { %v1821_v28 = vpop.xlane.xlu0 %1820 }
 0xb20   : > { %v1824_v29 = vpop.xlane.xlu1 %1823 }
 0xb21   : > { %3182 = vrcp.f32 %v1824_v29 }
 0xb22   : > { %3184 = vrcp.f32 %v1821_v28 }
 0xb28   : > { %v1948_v31 = vpop.xlane.xlu0 %1947 }
 0xb2c   : > { %v1951_v33 = vpop.xlane.xlu1 %1950 }
 0xb2d   : > { %3186 = vrcp.f32 %v1951_v33 }
 0xb2e   : > { %3188 = vrcp.f32 %v1948_v31  ;;  %v3183_v44 = vpop.eup %3182 }
 0xb2f   : > { %v3185_v46 = vpop.eup %3184  ;;  %v1828_v47 = vmul.f32 %v3183_v44, %v3169_v7 }
 0xb30   : > { %v2075_v35 = vpop.xlane.xlu0 %2074  ;;  %v1831_v42 = vpop.permute.xlu1 %1830  ;;  %v1827_v48 = vmul.f32 %v3185_v46, %v3727_v1 }
 0xb31   : > { %v1836_v45 = vsel %vm1706_vm5, %v1831_v42, 0  ;;  %3190 = vrcp.f32 %v2075_v35 }
 0xb32   : > { %v1829_v50 = vpack.c.bf16 %v1828_v47, %v1827_v48 }
 0xb34   : > { %v1702_v40 = vpop.permute.xlu0 %1701  ;;  %v1958_v49 = vpop.permute.xlu1 %1957 }
 0xb35   : > { %v1708_v52 = vsel %vm1706_vm5, %v1702_v40, 0  ;;  %v1963_v53 = vsel %vm1706_vm5, %v1958_v49, 0  ;;  %v1806_v49 = vadd.f32 %v3693_v23, %v3685_v14 }
 0xb36   : > { %2927 = vmatpush3.bf16.msra.mxu1 %v1708_v52 }
 0xb37   : > { %2938 = vmatprep.subr.bf16.mxu1 %v3272_v15 }
 0xb39   : > { %2929 = vmatmul.mubr.msk.bf16.vlgmr.msra.gmra.mxu1 %vm869_vm2, %v1699_v43 }
 0xb3a   : > { %2939 = vmatpush3.bf16.msra.mxu1 %v1836_v45  ;;  %2940 = vmatprep.mubr.msk.bf16.mxu1 %vm3273_vm1, %v3272_v15  ;;  %v3187_v51 = vpop.eup %3186 }
 0xb3b   : > { %2950 = vmatprep.subr.bf16.mxu1 %v3272_v15  ;;  %v3189_v54 = vpop.eup %3188  ;;  %v1955_v55 = vmul.f32 %v3187_v51, %v3173_v13  ;;  %v1933_v51 = vadd.f32 %v3701_v30, %v1806_v49  ;;  %v3110_v49 = vld [vmem:[%s3968_s16 + $0x8] sm:$0xff]  }
 0xb3c   : > { %v1954_v56 = vmul.f32 %v3189_v54, %v3733_v11 }
 0xb3d   : > { %v2060_v54 = vadd.f32 %v3709_v39, %v1933_v51  ;;  %v2235_v39 = vld [vmem:[%s751_s4] sm:$0xff] }
 0xb3e   : > { %v1956_v57 = vpack.c.bf16 %v1955_v55, %v1954_v56  ;;  %v3191_v61 = vpop.eup %3190  ;;  %v3112_v51 = vld [vmem:[%s3968_s16] sm:$0xff]  }
 0xb3f   : > { %v2081_v63 = vmul.f32 %v3191_v61, %v3738_v18  ;;  %v2234_v56 = vmul.f32 0.25, %v2060_v54 }
 0xb41   : > { %2941 = vmatmul.mubr.msk.bf16.vlgmr.msra.gmra.mxu1 %vm869_vm2, %v1829_v50  ;;  %v1805_v50 = vadd.f32 %v3689_v20, %v3681_v10 }
 0xb42   : > { %2951 = vmatpush3.bf16.msra.mxu1 %v1963_v53  ;;  %2952 = vmatprep.mubr.msk.bf16.mxu1 %vm3273_vm1, %v3272_v15 }
 0xb43   : > { %2962 = vmatprep.subr.bf16.mxu1 %v3272_v15  ;;  %v1932_v53 = vadd.f32 %v3697_v2, %v1805_v50  ;;  %v2236_v2 = vld [vmem:[%s751_s4 + $0x8] sm:$0xff]  ;;  %s732_s4 = scalar_lea.vmem [#allocation2], %s2708_s2  ;;  %s3216_s2 = scalar_lea.vmem %s3215_s1, 512 }
 0xb44   : > { %v3111_v50 = vld [vmem:[%s3970_s18 + $0x8] sm:$0xff]   ;;  %s2596_s24 = sshll.u32 %s732_s4, 4  ;;  %s3902_s24 = int_to_ptr.vmem [resolvable:$true] %s2596_s24 }
 0xb45   : > { %v2059_v55 = vadd.f32 %v3705_v34, %v1932_v53  ;;  %v3113_v53 = vld [vmem:[%s3970_s18] sm:$0xff]   ;;  %p3217_p0 = scmp.lt.s32.totalorder %s3902_s24, %s3215_s1 }
 0xb49   : > { %2953 = vmatmul.mubr.msk.bf16.vlgmr.msra.gmra.mxu1 %vm869_vm2, %v1956_v57  ;;  %v2233_v57 = vmul.f32 0.25, %v2059_v55 }
 0xb4a   : > { %2964 = vmatprep.mubr.msk.bf16.mxu1 %vm3273_vm1, %v3272_v15 }
 0xb65   : > { %v2078_v58 = vpop.xlane.xlu1 %2077 }
 0xb66   : > { %3192 = vrcp.f32 %v2078_v58  ;;  %v2244_v58 = vand.u32 2147483647, %v2234_v56 }
 0xb69   : > { %v2085_v59 = vpop.permute.xlu1 %2084 }
 0xb6a   : > { %v2090_v60 = vsel %vm1706_vm5, %v2085_v59, 0  ;;  %v2243_v59 = vand.u32 2147483647, %v2233_v57 }
 0xb6b   : > { %2963 = vmatpush3.bf16.msra.mxu1 %v2090_v60  ;;  %v2246_v60 = vsub.f32 0.0, %v2244_v58 }
 0xb6c   : > { %2976 = vmatprep.subr.bf16.mxu1 %v3272_v15  ;;  %v2245_v61 = vsub.f32 0.0, %v2243_v59 }
 0xb6e   : > { %v2247_v14 = vmul.f32 1.442695, %v2245_v61 }
 0xb73   : > { %v3193_v62 = vpop.eup %3192 }
 0xb74   : > { %v2082_v1 = vmul.f32 %v3193_v62, %v3177_v24  ;;  %v3109_v24 = vld [vmem:[%s3964_s12] sm:$0xff]   ;;  %v2249_v62 = vmul.f32 1.442695, %v2246_v60 }
 0xb75   : > { %2971 = vmatpush3.bf16.msra.mxu0 %v3109_v24 }
 0xb76   : > { %v2083_v3 = vpack.c.bf16 %v2082_v1, %v2081_v63  ;;  %2984 = vmatprep.subr.bf16.mxu0 %v3272_v15  ;;  %3194 = vpow2.f32 %v2249_v62  ;;  %v2238_v63 = vmax.f32 %v2234_v56, 0.0  ;;  %v2240_v1 = vmul.f32 %v2236_v2, %v2234_v56 }
 0xb77   : > { %3196 = vpow2.f32 %v2247_v14  ;;  %v2751_v14 = vld [vmem:[%s3966_s14] ss:$0 sm:$0xff] }
 0xb78   : > { %2965 = vmatmul.mubr.msk.bf16.vlgmr.msra.gmra.mxu1 %vm869_vm2, %v2083_v3 }
 0xb79   : > { %2980 = vmatprep.mubr.msk.bf16.mxu1 %vm3273_vm1, %v3272_v15  ;;  %2977 = vmatpush3.bf16.msra.mxu1 %v3110_v49 }
 0xb7a   : > { %2978 = vmatprep.subr.bf16.mxu1 %v3272_v15 }
 0xb7d   : > { %2979 = vmatpush3.bf16.msra.mxu1 %v3112_v51 }
 0xb7e   : > { %2992 = vmatprep.subr.bf16.mxu1 %v3272_v15 }
 0xb83   : > { %v3195_v10 = vpop.eup %3194 }
 0xb84   : > { %v3197_v20 = vpop.eup %3196  ;;  %v2252_v23 = vadd.f32 1.0, %v3195_v10 }
 0xb85   : > { %v2251_v30 = vadd.f32 1.0, %v3197_v20 }
 0xb86   : > { %3198 = vlog2.f32 %v2252_v23 }
 0xb87   : > { %3200 = vlog2.f32 %v2251_v30  ;;  %v2752_v30 = vld [vmem:[%s3967_s15] ss:$0 sm:$0xff] }
 0xb93   : > { %v3199_v34 = vpop.eup %3198 }
 0xb94   : > { %v3201_v3 = vpop.eup %3200 }
 0xbf9   : > { %v1744_v4 = vpop.f32.mrf.mxu1 }
 0xbfb   : > { %v2930_v5 = vpop.f32.mrf.mxu1 }
 0xbfc   : > { %v2239_v5 = vmul.f32 %v2235_v39, %v2233_v57 }
 0xbfd   : > { %v1747_v6 = vpop.f32.mrf.mxu1 }
 0xbff   : > { %v2931_v7 = vpop.f32.mrf.mxu1 }
 0xc00   : > { %v2747_v7 = vld [vmem:[%s3965_s13] ss:$0 sm:$0xff] }
 0xc01   : > { %v1872_v8 = vpop.f32.mrf.mxu1 }
 0xc03   : > { %v2942_v9 = vpop.f32.mrf.mxu1 }
 0xc04   : > { %v2254_v9 = vmul.f32 0.6931472, %v3201_v3  ;;  %v3115_v3 = vld [vmem:[%s3972_s20 + $0x30] sm:$0xff]  }
 0xc05   : > { %v1875_v11 = vpop.f32.mrf.mxu1 }
 0xc06   : > { %v3085_v13 = vpack.i.bf16 %v1875_v11, %v1872_v8  ;;  %v2242_v8 = vsub.f32 %v2238_v63, %v2240_v1  ;;  %v3114_v1 = vld [vmem:[%s3972_s20 + $0x38] sm:$0xff]  }
 0xc07   : > { %v2943_v16 = vpop.f32.mrf.mxu1 }
 0xc08   : > { %3086 = vrot.lane.b32.xlu0 %v3085_v13, %s4031_s25 }
 0xc09   : > { %v1999_v18 = vpop.f32.mrf.mxu1 }
 0xc0b   : > { %v2954_v19 = vpop.f32.mrf.mxu1 }
 0xc0d   : > { %v2002_v0 = vpop.f32.mrf.mxu1 }
 0xc0e   : > { %v3090_v21 = vpack.i.bf16 %v2002_v0, %v1999_v18 }
 0xc0f   : > { %v2955_v22 = vpop.f32.mrf.mxu1 }
 0xc10   : > { %3091 = vrot.lane.b32.xlu1 %v3090_v21, %s4032_s26  ;;  %s2777_s26 = sshll.u32 %s3431_s5, 8  ;;  %s3210_s5 = scalar_lea.vmem %s3902_s24, 256 }
 0xc11   : > { %p3211_p11 = scmp.ne.s32.totalorder %s3902_s24, %s3210_s5  ;;  %p3218_p1 = scmp.lt.s32.totalorder %s3216_s2, %s3210_s5 }
 0xc13   : > { %p3212_p12 = pnand %p3211_p11, %p3448_p5  ;;  %p3219_p2 = por %p3218_p1, %p3217_p0 }
 0xc15   : > { %p3213_p13 = pneg %p3212_p12 }
 0xc17   : > { %p3220_p3 = pnand %p3219_p2, %p3213_p13 }
 0xc38   : > { %v2126_v25 = vpop.f32.mrf.mxu1 }
 0xc3a   : > { %v2966_v26 = vpop.f32.mrf.mxu1 }
 0xc3c   : > { %v2129_v27 = vpop.f32.mrf.mxu1 }
 0xc3d   : > { %v3095_v28 = vpack.i.bf16 %v2129_v27, %v2126_v25 }
 0xc3e   : > { %v2967_v29 = vpop.f32.mrf.mxu1 }
 0xc3f   : > { %3096 = vrot.lane.b32.xlu0 %v3095_v28, %s4033_s3  ;;  %s3908_s3 = scalar_lea.hbm %s3974_s22, %s2777_s26 }
 0xc7a   : > { %v3087_v31 = vpop.permute.xlu0 %3086 }
 0xc7b   : > { %v3089_v33 = vunpack.i.h.bf16 %v3087_v31  ;;  %v3088_v35 = vunpack.i.l.bf16 %v3087_v31 }
 0xc7d   : > { %v2158_v52 = vsel %vm869_vm2, %v1747_v6, %v3089_v33  ;;  %v2157_v41 = vsel %vm869_vm2, %v1744_v4, %v3088_v35  ;;  %v2237_v4 = vmax.f32 %v2233_v57, 0.0  ;;  %v2256_v6 = vmul.f32 0.6931472, %v3199_v34 }
 0xc7f   : > { %v2241_v13 = vsub.f32 %v2237_v4, %v2239_v5  ;;  %v2258_v16 = vadd.f32 %v2256_v6, %v2242_v8  ;;  %v3116_v4 = vld [vmem:[%s3972_s20 + $0x28] sm:$0xff]   ;;  %v3117_v5 = vld [vmem:[%s3972_s20 + $0x20] sm:$0xff]   ;;  %v3118_v6 = vld [vmem:[%s3972_s20 + $0x18] sm:$0xff]  }
 0xc80   : > { %v3120_v8 = vld [vmem:[%s3972_s20 + $0x8] sm:$0xff]  }
 0xc81   : > { %v2257_v0 = vadd.f32 %v2254_v9, %v2241_v13  ;;  %v2260_v25 = vsel %vm869_vm2, %v2258_v16, 0.0  ;;  %v3121_v9 = vld [vmem:[%s3972_s20] sm:$0xff]  }
 0xc82   : > { %v3092_v32 = vpop.permute.xlu1 %3091 }
 0xc83   : > { %v3094_v36 = vunpack.i.h.bf16 %v3092_v32  ;;  %v3093_v38 = vunpack.i.l.bf16 %v3092_v32  ;;  %v2259_v28 = vsel %vm869_vm2, %v2257_v0, 0.0 }
 0xc84   : > { %v2261_v29 = vadd.f32 %v2260_v25, %v2259_v28 }
 0xc85   : > { %v2160_v44 = vsel %vm919_vm3, %v2158_v52, %v3094_v36  ;;  %v2159_v45 = vsel %vm919_vm3, %v2157_v41, %v3093_v38 }
 0xcb1   : > { %v3097_v40 = vpop.permute.xlu0 %3096 }
 0xcb2   : > { %v3099_v42 = vunpack.i.h.bf16 %v3097_v40  ;;  %v3098_v43 = vunpack.i.l.bf16 %v3097_v40 }
 0xcb4   : > { %v2161_v46 = vsel %vm1387_vm4, %v2159_v45, %v3098_v43  ;;  %v2162_v47 = vsel %vm1387_vm4, %v2160_v44, %v3099_v42 }
 0xcb5   : > { %v2163_v48 = vpack.c.bf16 %v2162_v47, %v2161_v46 }
 0xcb7   : > { %2973 = vmatmul.mubr.msk.bf16.vlgmr.msra.gmra.mxu0 %vm760_vm0, %v2163_v48 }
 0xcb8   : > { %2988 = vmatprep.mubr.msk.bf16.mxu0 %vm3273_vm1, %v3272_v15  ;;  %2985 = vmatpush3.bf16.msra.mxu0 %v3111_v50 }
 0xcb9   : > { %2986 = vmatprep.subr.bf16.mxu0 %v3272_v15 }
 0xcbc   : > { %2987 = vmatpush3.bf16.msra.mxu0 %v3113_v53 }
 0xd77   : > { %v2224_v11 = vpop.f32.mrf.mxu0 }
 0xd78   : > { %v2225_v37 = vadd.f32 %v2747_v7, %v2224_v11  ;;  %v2757_v11 = vld [vmem:[%s3971_s19] ss:$0 sm:$0xff] }
 0xd79   : > { %v2974_v18 = vpop.f32.mrf.mxu0 }
 0xd7a   : > { %v3814_v19 = vadd.f32 %v2225_v37, %v3604_v12 }
 0xd7b   : > { %v2227_v21 = vpop.f32.mrf.mxu0 }
 0xd7c   : > { %v2228_v22 = vadd.f32 %v2747_v7, %v2227_v21  ;;  %v2276_v24 = vsel %vm760_vm0, %v3814_v19, 0.0  ;;  %v3119_v7 = vld [vmem:[%s3972_s20 + $0x10] sm:$0xff]  }
 0xd7d   : > { %2277 = vadd.xlane.f32.xlu1 %v2276_v24  ;;  %v2975_v26 = vpop.f32.mrf.mxu0 }
 0xd7e   : > { %v3820_v27 = vadd.f32 %v2228_v22, %v3609_v17 }
 0xd80   : > { %v2279_v12 = vsel %vm760_vm0, %v3820_v27, 0.0 }
 0xd81   : > { %2262 = vadd.xlane.f32.xlu1 %v2261_v29  ;;  %2280 = vadd.xlane.f32.xlu0 %v2279_v12 }
 0xe06   : > { %v2278_v31 = vpop.xlane.xlu1 %2277 }
 0xe07   : > { %v2282_v32 = vmul.f32 0.03125, %v2278_v31 }
 0xe09   : > { %v2284_v33 = vsub.f32 %v3814_v19, %v2282_v32 }
 0xe0a   : > { %v2263_v35 = vpop.xlane.xlu1 %2262  ;;  %v2281_v36 = vpop.xlane.xlu0 %2280 }
 0xe0b   : > { %v2264_v38 = vrot.slane %v2263_v35, 4  ;;  %v2283_v40 = vmul.f32 0.03125, %v2281_v36  ;;  %v2286_v52 = vmul.f32 %v2284_v33, %v2284_v33 }
 0xe0d   : > { %v2265_v41 = vadd.f32 %v2264_v38, %v2263_v35  ;;  %v2285_v17 = vsub.f32 %v3820_v27, %v2283_v40  ;;  %v2288_v42 = vsel %vm760_vm0, %v2286_v52, 0.0 }
 0xe0e   : > { %2289 = vadd.xlane.f32.xlu0 %v2288_v42 }
 0xe0f   : > { %v2266_v43 = vrot.slane %v2265_v41, 2  ;;  %v2287_v44 = vmul.f32 %v2285_v17, %v2285_v17 }
 0xe11   : > { %v2291_v45 = vsel %vm760_vm0, %v2287_v44, 0.0  ;;  %v2267_v46 = vadd.f32 %v2266_v43, %v2265_v41  ;;  %v2761_v44 = vld [vmem:[%s3973_s21] ss:$0 sm:$0xff] }
 0xe12   : > { %2292 = vadd.xlane.f32.xlu0 %v2291_v45 }
 0xe13   : > { %v2268_v47 = vrot.slane %v2267_v46, 1 }
 0xe15   : > { %v2269_v48 = vadd.f32 %v2268_v47, %v2267_v46 }
 0xe17   : > { %3012 = vpush %v2269_v48 }
 0xe48   : > { %s3013_s0 = spop %3012 }
 0xe49   : > { %v2271_v54 = vstv %s3013_s0 }
 0xe4a   : > { %2273 = vst.msk [vmem:[%s754_s28] sm:$0x1] %vm2272_vm6, %v2271_v54 }
 0xe97   : > { %v2290_v55 = vpop.xlane.xlu0 %2289 }
 0xe98   : > { %v2294_v56 = vmul.f32 0.03125, %v2290_v55 }
 0xe9a   : > { %v2296_v57 = vadd.f32 1e-05, %v2294_v56 }
 0xe9b   : > { %v2293_v58 = vpop.xlane.xlu0 %2292 }
 0xe9c   : > { %3202 = vrsqrt.f32 %v2296_v57  ;;  %v2295_v59 = vmul.f32 0.03125, %v2293_v58 }
 0xe9e   : > { %v2297_v60 = vadd.f32 1e-05, %v2295_v59 }
 0xea0   : > { %3204 = vrsqrt.f32 %v2297_v60 }
 0xea9   : > { %v3203_v61 = vpop.eup %3202 }
 0xeaa   : > { %v2300_v62 = vmul.f32 %v3203_v61, %v2284_v33  ;;  %v2753_v33 = vld [vmem:[%s3969_s17] ss:$0 sm:$0xff] }
 0xeac   : > { %v2308_v23 = vmul.f32 %v2751_v14, %v2300_v62 }
 0xead   : > { %v3205_v10 = vpop.eup %3204 }
 0xeae   : > { %v2301_v20 = vmul.f32 %v3205_v10, %v2285_v17  ;;  %v2316_v34 = vadd.f32 %v2752_v30, %v2308_v23 }
 0xeb0   : > { %v2309_v2 = vmul.f32 %v2751_v14, %v2301_v20 }
 0xeb2   : > { %v2317_v39 = vadd.f32 %v2752_v30, %v2309_v2 }
 0xeb4   : > { %v2318_v63 = vpack.c.bf16 %v2317_v39, %v2316_v34 }
 0xeb6   : > { %2981 = vmatmul.mubr.msk.bf16.vlgmr.msra.gmra.mxu1 %vm760_vm0, %v2318_v63  ;;  %2989 = vmatmul.mubr.msk.bf16.vlgmr.msra.gmra.mxu0 %vm760_vm0, %v2318_v63 }
 0xeb7   : > { %3008 = vmatprep.mubr.msk.bf16.mxu1 %vm3273_vm1, %v3272_v15  ;;  %2993 = vmatpush3.bf16.msra.mxu1 %v3114_v1 }
 0xeb8   : > { %2994 = vmatprep.subr.bf16.mxu1 %v3272_v15 }
 0xebb   : > { %2995 = vmatpush3.bf16.msra.mxu1 %v3115_v3 }
 0xebc   : > { %2996 = vmatprep.subr.bf16.mxu1 %v3272_v15 }
 0xebf   : > { %2997 = vmatpush3.bf16.msra.mxu1 %v3116_v4 }
 0xec0   : > { %2998 = vmatprep.subr.bf16.mxu1 %v3272_v15 }
 0xec3   : > { %2999 = vmatpush3.bf16.msra.mxu1 %v3117_v5 }
 0xec4   : > { %3000 = vmatprep.subr.bf16.mxu1 %v3272_v15 }
 0xec7   : > { %3001 = vmatpush3.bf16.msra.mxu1 %v3118_v6 }
 0xec8   : > { %3002 = vmatprep.subr.bf16.mxu1 %v3272_v15 }
 0xecb   : > { %3003 = vmatpush3.bf16.msra.mxu1 %v3119_v7 }
 0xecc   : > { %3004 = vmatprep.subr.bf16.mxu1 %v3272_v15 }
 0xecf   : > { %3005 = vmatpush3.bf16.msra.mxu1 %v3120_v8 }
 0xed0   : > { %3006 = vmatprep.subr.bf16.mxu1 %v3272_v15 }
 0xed3   : > { %3007 = vmatpush3.bf16.msra.mxu1 %v3121_v9 }
 0xf76   : > { %v2379_v37 = vpop.f32.mrf.mxu1  ;;  %v2443_v13 = vpop.f32.mrf.mxu0 }
 0xf77   : > { %v2444_v16 = vadd.f32 %v2757_v11, %v2443_v13  ;;  %v2380_v40 = vadd.f32 %v2753_v33, %v2379_v37 }
 0xf78   : > { %v2982_v18 = vpop.f32.mrf.mxu1  ;;  %v2990_v0 = vpop.f32.mrf.mxu0 }
 0xf79   : > { %v2452_v21 = vmul.f32 0.70710677, %v2444_v16  ;;  %v2450_v31 = vmul.f32 0.5, %v2444_v16 }
 0xf7a   : > { %v2382_v22 = vpop.f32.mrf.mxu1  ;;  %v2446_v24 = vpop.f32.mrf.mxu0 }
 0xf7b   : > { %3206 = verf.f32 %v2452_v21  ;;  %v2447_v25 = vadd.f32 %v2757_v11, %v2446_v24  ;;  %v2383_v52 = vadd.f32 %v2753_v33, %v2382_v22 }
 0xf7c   : > { %v2983_v15 = vpop.f32.mrf.mxu1  ;;  %v2991_v26 = vpop.f32.mrf.mxu0 }
 0xf7d   : > { %v2453_v28 = vmul.f32 0.70710677, %v2447_v25  ;;  %v2451_v36 = vmul.f32 0.5, %v2447_v25 }
 0xf7f   : > { %3208 = verf.f32 %v2453_v28 }
 0xf88   : > { %v3207_v29 = vpop.eup %3206 }
 0xf89   : > { %v2456_v12 = vadd.f32 1.0, %v3207_v29 }
 0xf8b   : > { %v2458_v35 = vmul.f32 %v2456_v12, %v2450_v31 }
 0xf8c   : > { %v3209_v32 = vpop.eup %3208 }
 0xf8d   : > { %v2457_v38 = vadd.f32 1.0, %v3209_v32  ;;  %v2460_v17 = vmul.f32 %v2458_v35, %v2380_v40 }
 0xf8f   : > { %v2459_v41 = vmul.f32 %v2457_v38, %v2451_v36 }
 0xf91   : > { %v2461_v42 = vmul.f32 %v2459_v41, %v2383_v52 }
 0xf93   : > { %v2462_v43 = vpack.c.bf16 %v2461_v42, %v2460_v17 }
 0xf95   : > { %3009 = vmatmul.mubr.bf16.vlgmr.msra.gmra.mxu1 %v2462_v43 }
0x1055   : > { %v2568_v45 = vpop.f32.mrf.mxu1 }
0x1056   : > { %v2569_v46 = vadd.f32 %v2761_v44, %v2568_v45 }
0x1057   : > { %v3010_v47 = vpop.f32.mrf.mxu1 }
0x1058   : > { %v2575_v48 = vadd.f32 %v2569_v46, %v3814_v19 }
0x1059   : > { %v2571_v49 = vpop.f32.mrf.mxu1 }
0x105a   : > { %2577 = vst.msk [vmem:[%s732_s4] sm:$0xff] %vm760_vm0, %v2575_v48  ;;  %v2572_v50 = vadd.f32 %v2761_v44, %v2571_v49 }
0x105b   : > { %v3011_v51 = vpop.f32.mrf.mxu1 }
0x105c   : > { %v2576_v53 = vadd.f32 %v2572_v50, %v3820_v27 }
0x105e   : > { %2578 = vst.msk [vmem:[%s732_s4 + $0x8] sm:$0xff] %vm760_vm0, %v2576_v53 }
0x105f   : > { %3223 = shalt.err (!%p3220_p3)
}
0x1060   : > { %s3224_s29 = scalar_lea.hbm %s3908_s3, 256  ;;  %s3228_s28 = scalar_lea.hbm %s3974_s22, 512 }
0x1061   : > { %p3225_p4 = scmp.ne.s32.totalorder %s3908_s3, %s3224_s29  ;;  %p3229_p9 = scmp.lt.s32.totalorder %s3908_s3, %s3974_s22 }
0x1062   : > { %p3230_p10 = scmp.lt.s32.totalorder %s3228_s28, %s3224_s29 }
0x1063   : > { %p3226_p7 = pnand %p3225_p4, %p3448_p5 }
0x1064   : > { %p3231_p11 = por %p3230_p10, %p3229_p9 }
0x1065   : > { %p3227_p8 = pneg %p3226_p7 }
0x1067   : > { %p3232_p12 = pnand %p3231_p11, %p3227_p8 }
0x1069   : > { %3235 = shalt.err (!%p3232_p12)
}
0x106a   : > { %s3289_s5 = smov 128  }
0x106b   : > { %3014 = dma.vmem_to_hbm [thread:$0]  (%p3448_p5), %s3902_s24, 256, %s3908_s3, %s3911_s27, %s3289_s5, %s3289_s5, %s4031_s25  }
0x106c PF: > { %s4036_s1 = sld [smem:[#allocation7_spill]] }
0x106d   : > { %s4037_s2 = sld [smem:[#allocation5_spill]] }
0x1072   : > { %p3020_p13 = scmp.ge.s32.totalorder %s4036_s1, 2 }
0x1073   : > { %s2614_s26 = sand.u32 1, %s4037_s2  }
0x1074   : > { %p3017_p0 = pnand %p3020_p13, %p3452_p6  ;;  %s2615_s29 = scalar_lea.sflag [#allocation3], %s2614_s26 }
0x1076   : > { %p3018_p1 = pneg %p3017_p0 }
0x1078   : > { %3253 = dma.done.wait (%p3018_p1), %s2615_s29, 256  }
0x1079   : > { %3255 = vsyncadd (%p3018_p1), %s2615_s29, 4294967040  ;;  %s4039_s25 = sld [smem:[#allocation8_spill]]  ;;  %s4042_s4 = smov %s3262_s30 }
0x107a   : > { %s4040_s7 = sld [smem:[#allocation6_spill]] }
0x107b   : > { %s4041_s24 = sld [smem:[#allocation9_spill]] }
0x107f   : > { %p34_p2 = scmp.ge.s32.totalorder %s4039_s25, 4  }
0x1080   : > { %s4043_s30 = smov %s4040_s7 }
0x1081   :  { %36 = sbr.rel (!%p34_p2) target bundleno = 12 (0xc), region = 161 }
0x1086   :  { %2626 = vsyncpa [#allocation3], 1 }
0x1087   :  { %2628 = vsyncpa [#allocation3 + $0x1], 1 }

</bundles_post_ra>
